<compile_context>
chip_gen: v5e
topology: v5e:2x2
jax: 0.10.0
libtpu: 0.0.40
codegen_flags: <defaults>
</compile_context>

<pallas_src>
import numpy as np
import jax
import jax.numpy as jnp
from jax.experimental import pallas as pl
from jax.experimental.pallas import tpu as pltpu


def _round_up(x, m):
    return ((x + m - 1) // m) * m


def _pick_tile_h(h, wp, x_row_bytes, cout_p, budget_bytes):
    """Largest divisor of H whose double-buffered slab + f32 acc fits VMEM."""
    for th in range(h, 0, -1):
        if h % th:
            continue
        slab = (th + 2) * wp * x_row_bytes      # one (tile_h+2)-row input slab
        acc = th * wp * cout_p * 4              # f32 conv accumulator scratch
        if 2 * slab + acc <= budget_bytes:
            return th
    return 1  # pathological W*Cin: fall back to single-row tiles


# ----------------------------------------------------------------------------
# Fused Pallas kernel: conv3x3(SAME) + bias + ReLU + global-avg-pool + linear
# ----------------------------------------------------------------------------
def fused_conv_relu_pool_linear(x_nhwc, conv_w, conv_b, lin_w, lin_b, *,
                                tile_h=None, lane_multiple=None,
                                matmul_dtype=None):
    """x_nhwc: (N, H, W, Cin)   conv_w: (Cout, Cin, 3, 3)   conv_b: (Cout,)
    lin_w: (Cout, F)           lin_b: (F,)
    Returns (N, F) float32 = linear(global_avg_pool(relu(conv3x3(x) + b)))."""
    n, h, w, cin = x_nhwc.shape
    cout = conv_w.shape[0]
    f = lin_w.shape[1]
    wp = w + 2                                   # padded width (SAME, 3x3)

    if matmul_dtype is None:
        # bf16 operands ~4x f32 MXU throughput on v6e/v7x and halve x/w VMEM;
        # keep f32 for tiny channel counts (numerics, toy shapes are not
        # MXU-bound anyway).
        matmul_dtype = jnp.bfloat16 if (cin >= 64 and cout >= 64) else jnp.float32
    if lane_multiple is None:
        # 256-wide output tiles fill v6e/v7x's 2x256 MXU for real heads;
        # 128 is already optimal on v5e and for tiny Cout/F.
        lane_multiple = 256 if max(cout, f) > 128 else 128

    cin_p = _round_up(max(cin, 8), 8)            # contraction: full sublane tile
    cout_p = _round_up(max(cout, lane_multiple), lane_multiple)
    f_p = _round_up(max(f, lane_multiple), lane_multiple)
    x_bytes = jnp.dtype(matmul_dtype).itemsize

    if tile_h is None:
        weight_vmem = 2 * (9 * cin_p * cout_p * x_bytes + cout_p * f_p * 4
                           + cout_p * 4 + 2 * f_p * 4)
        budget = max(2 * 1024 * 1024, 12 * 1024 * 1024 - weight_vmem)
        tile_h = _pick_tile_h(h, wp, cin_p * x_bytes, cout_p, budget)
    assert h % tile_h == 0, "tile_h must divide H"
    n_tiles = h // tile_h
    m_tile = tile_h * wp                         # GEMM rows per grid step
    # +8 zero rows so the bottom-right tap's flattened window stays in bounds
    slab_rows = _round_up((tile_h + 2) * wp + 8, 8)
    inv_hw = 1.0 / float(h * w)

    # ---- host prep: pad, cast, and cut overlapping row slabs (2-row halo) so
    # each grid step stages only (tile_h+2) rows in VMEM (scales with tile_h,
    # not H*W*Cin -> safe against v7x's 64 MiB VMEM per TensorCore). ----
    xp = jnp.pad(x_nhwc, ((0, 0), (1, 1), (1, 1), (0, cin_p - cin)))
    xp = xp.astype(matmul_dtype)
    slabs = jnp.stack(
        [xp[:, t * tile_h: t * tile_h + tile_h + 2] for t in range(n_tiles)],
        axis=1)                                  # (N, T, tile_h+2, W+2, cin_p)
    x_slabs = slabs.reshape(n, n_tiles, (tile_h + 2) * wp, cin_p)
    x_slabs = jnp.pad(
        x_slabs, ((0, 0), (0, 0), (0, slab_rows - (tile_h + 2) * wp), (0, 0)))

    # conv weights as 9 taps: (Cout, Cin, 3, 3) -> (9, cin_p, cout_p)
    w_taps = jnp.transpose(conv_w, (2, 3, 1, 0)).reshape(9, cin, cout)
    w_taps = jnp.pad(w_taps, ((0, 0), (0, cin_p - cin), (0, cout_p - cout)))
    w_taps = w_taps.astype(matmul_dtype)
    b_p = jnp.pad(conv_b, (0, cout_p - cout)).reshape(1, cout_p).astype(jnp.float32)
    lw_p = jnp.pad(lin_w, ((0, cout_p - cout), (0, f_p - f))).astype(jnp.float32)
    lb_p = jnp.pad(lin_b, (0, f_p - f)).reshape(1, f_p).astype(jnp.float32)

    # Pooling mask as a lane-dense (1, m_tile) row used as an MXU operand.
    # Columns >= W within each (W+2) stride are wrap-around conv outputs at
    # padded positions: they MUST stay zero (correctness), and 1/(H*W) is
    # folded in so finalize needs no extra scale.
    col = jnp.arange(m_tile, dtype=jnp.int32) % wp
    mask_row = jnp.where(col < w, jnp.float32(inv_hw),
                         jnp.float32(0.0)).reshape(1, m_tile)

    def kernel(x_ref, msk_ref, w_ref, b_ref, lw_ref, lb_ref, o_ref,
               acc_ref, psum_ref):
        t = pl.program_id(1)

        @pl.when(t == 0)
        def _init():
            psum_ref[...] = jnp.zeros_like(psum_ref)

        # --- conv3x3 on this row slab: 9 statically-shifted matmuls, f32
        # accumulation in a VMEM scratch (bounded vreg pressure) ---
        for kh in range(3):
            for kw in range(3):
                start = kh * wp + kw                       # static per tap
                xs = x_ref[pl.ds(start, m_tile), :]        # (m_tile, cin_p)
                partial = jnp.dot(xs, w_ref[kh * 3 + kw],
                                  preferred_element_type=jnp.float32)
                if kh == 0 and kw == 0:
                    acc_ref[...] = partial
                else:
                    acc_ref[...] += partial

        feat = jnp.maximum(acc_ref[...] + b_ref[...], 0.0)  # bias + ReLU (f32)

        # --- fused global-avg-pool on the MXU: (1,m_tile) @ (m_tile,cout_p) ---
        psum_ref[...] += jnp.dot(msk_ref[...], feat,
                                 preferred_element_type=jnp.float32)

        # --- finalize on the last row tile: linear head (mean already baked
        # into the mask) ---
        @pl.when(t == pl.num_programs(1) - 1)
        def _finalize():
            o_ref[0] = (jnp.dot(psum_ref[...], lw_ref[...],
                                preferred_element_type=jnp.float32)
                        + lb_ref[...]).astype(o_ref.dtype)

    # VMEM estimate (double-buffered inputs/outputs + scratches); capped at
    # 32 MiB so the same tiling stays inside v7x's smaller per-core VMEM.
    vmem_est = (2 * slab_rows * cin_p * x_bytes
                + 2 * m_tile * 4
                + 2 * 9 * cin_p * cout_p * x_bytes
                + 2 * cout_p * 4
                + 2 * cout_p * f_p * 4
                + 2 * f_p * 4
                + 2 * f_p * 4
                + m_tile * cout_p * 4
                + cout_p * 4)
    vmem_limit = int(min(32 * 1024 * 1024, max(16 * 1024 * 1024, 2 * vmem_est)))

    out = pl.pallas_call(
        kernel,
        out_shape=jax.ShapeDtypeStruct((n, 1, f_p), jnp.float32),
        grid_spec=pltpu.PrefetchScalarGridSpec(
            num_scalar_prefetch=0,
            grid=(n, n_tiles),
            in_specs=[
                # row slab for (batch i, tile t); leading dims squeezed
                pl.BlockSpec((None, None, slab_rows, cin_p),
                             lambda i, t: (i, t, 0, 0)),
                pl.BlockSpec((1, m_tile), lambda i, t: (0, 0)),
                pl.BlockSpec((9, cin_p, cout_p), lambda i, t: (0, 0, 0)),
                pl.BlockSpec((1, cout_p), lambda i, t: (0, 0)),
                pl.BlockSpec((cout_p, f_p), lambda i, t: (0, 0)),
                pl.BlockSpec((1, f_p), lambda i, t: (0, 0)),
            ],
            out_specs=pl.BlockSpec((1, 1, f_p), lambda i, t: (i, 0, 0)),
            scratch_shapes=[pltpu.VMEM((m_tile, cout_p), jnp.float32),
                            pltpu.VMEM((1, cout_p), jnp.float32)],
        ),
        compiler_params=pltpu.CompilerParams(
            # batch axis parallel (v7x's 2nd TensorCore), row-tile axis is the
            # pool reduction -> must stay sequential ("arbitrary").
            dimension_semantics=("parallel", "arbitrary"),
            vmem_limit_bytes=vmem_limit,
        ),
    )(x_slabs, mask_row, w_taps, b_p, lw_p, lb_p)

    return out[:, 0, :f]                                     # (N, F)


# ----------------------------------------------------------------------------
# Minimal synthetic "MindSpore-like" graph + the module that walks it
# (mirrors MindSporeModule.forward's node-walking semantics)
# ----------------------------------------------------------------------------
class _SyntheticNet:
    def __init__(self, conv_w, conv_b, lin_w, lin_b):
        self.sorted_nodes = ["input_0", "ops_fused_head"]
        self.inputs = ["input_0", "x"]       # [placeholder_node, real_input_name]
        self.nodes = {}
        self.pre_edges = {"ops_fused_head": ["input_0"]}
        self.out_edges = {"ops_fused_head": ["out"]}
        self.outputs = ["out", "out_name"]   # [::2] -> ["out"]
        fused = jax.jit(fused_conv_relu_pool_linear)
        self.ops = {
            "ops_fused_head": lambda a: fused(a, conv_w, conv_b, lin_w, lin_b),
        }


class MindSporeModuleJAX:
    """JAX re-implementation of MindSporeModule.forward (graph executor)."""

    def __init__(self, net, input_names, output_names):
        self.net = net
        self.input_names = input_names
        self.output_names = output_names
        # TODO(synk): _register_state_dict_hook / _load_from_state_dict are
        # host-side torch checkpoint plumbing with no Pallas/JAX equivalent.

    @staticmethod
    def _cast_like_forward(a):
        a = jnp.asarray(a)
        if a.dtype == jnp.int64:
            a = a.astype(jnp.int32)
        if a.dtype == jnp.float64:
            a = a.astype(jnp.float32)
        return a

    def forward(self, *inputs):
        for a_node in self.net.sorted_nodes:
            if a_node in self.net.inputs:
                real_node = self.net.inputs[self.net.inputs.index(a_node) + 1]
                name_index = self.input_names.index(real_node)
                self.net.nodes[a_node] = self._cast_like_forward(inputs[name_index])
            elif a_node.startswith("ops"):
                ops_inputs = [self.net.nodes[p] for p in self.net.pre_edges[a_node]]
                ms_outputs = self.net.ops[a_node](*ops_inputs)
                if len(self.net.out_edges[a_node]) == 1:
                    self.net.nodes[self.net.out_edges[a_node][0]] = ms_outputs
                else:
                    for i in range(len(self.net.out_edges[a_node])):
                        self.net.nodes[self.net.out_edges[a_node][i]] = ms_outputs[i]
            else:
                continue
        outputs = tuple(self.net.nodes[k] for k in self.net.outputs[::2])
        if len(outputs) == 1:
            outputs = outputs[0]
        return outputs

    __call__ = forward


# ----------------------------------------------------------------------------
# Demo / self-test
# ----------------------------------------------------------------------------
if __name__ == "__main__":
    key = jax.random.PRNGKey(0)
    k_x, k_cw, k_cb, k_lw, k_lb = jax.random.split(key, 5)

    N, H, W, CIN = 2, 16, 16, 4       # module-level layout is NHWC
    COUT, FEAT = 8, 32

    x = jax.random.normal(k_x, (N, H, W, CIN), dtype=jnp.float32)
    conv_w = 0.1 * jax.random.normal(k_cw, (COUT, CIN, 3, 3), dtype=jnp.float32)
    conv_b = 0.1 * jax.random.normal(k_cb, (COUT,), dtype=jnp.float32)
    lin_w = 0.1 * jax.random.normal(k_lw, (COUT, FEAT), dtype=jnp.float32)
    lin_b = 0.1 * jax.random.normal(k_lb, (FEAT,), dtype=jnp.float32)

    net = _SyntheticNet(conv_w, conv_b, lin_w, lin_b)
    module = MindSporeModuleJAX(net, input_names=["x"], output_names=["out"])

    out = module(x)
    out = jax.block_until_ready(out)

    # Pure-JAX reference for correctness.
    ref_feat = jax.nn.relu(
        jax.lax.conv_general_dilated(
            x, conv_w, window_strides=(1, 1), padding="SAME",
            dimension_numbers=("NHWC", "OIHW", "NHWC"),
        )
        + conv_b[None, None, None, :]
    )
    ref_out = jnp.mean(ref_feat, axis=(1, 2)) @ lin_w + lin_b

    assert out.shape == (N, FEAT), out.shape
    np.testing.assert_allclose(np.asarray(out), np.asarray(ref_out),
                               rtol=1e-3, atol=1e-4)
    print("KERNEL_OK")
</pallas_src>

<mosaic_0001>
module attributes {stable_mosaic.version = 11 : i64} {
  func.func @kernel(%arg0: i32, %arg1: i32, %arg2: memref<1x1x336x8xf32, #tpu.memory_space<vmem>>, %arg3: memref<1x288xf32, #tpu.memory_space<vmem>>, %arg4: memref<9x8x128xf32, #tpu.memory_space<vmem>>, %arg5: memref<1x128xf32, #tpu.memory_space<vmem>>, %arg6: memref<128x128xf32, #tpu.memory_space<vmem>>, %arg7: memref<1x128xf32, #tpu.memory_space<vmem>>, %arg8: memref<1x1x128xf32, #tpu.memory_space<vmem>>, %arg9: memref<288x128xf32, #tpu.memory_space<vmem>>, %arg10: memref<1x128xf32, #tpu.memory_space<vmem>>) attributes {dimension_semantics = [#tpu.dimension_semantics<parallel>, #tpu.dimension_semantics<arbitrary>], iteration_bounds = array<i64: 2, 1>, scalar_prefetch = 0 : i64, scratch_operands = 2 : i64, tpu.core_type = #tpu.core_type<tc>, window_params = [{transform_indices = @transform_0, window_bounds = array<i64: 1, 1, 336, 8>}, {pipeline_mode = #tpu.pipeline_mode<synchronous>, transform_indices = @transform_1, window_bounds = array<i64: 1, 288>}, {pipeline_mode = #tpu.pipeline_mode<synchronous>, transform_indices = @transform_2, window_bounds = array<i64: 9, 8, 128>}, {pipeline_mode = #tpu.pipeline_mode<synchronous>, transform_indices = @transform_3, window_bounds = array<i64: 1, 128>}, {pipeline_mode = #tpu.pipeline_mode<synchronous>, transform_indices = @transform_4, window_bounds = array<i64: 128, 128>}, {pipeline_mode = #tpu.pipeline_mode<synchronous>, transform_indices = @transform_5, window_bounds = array<i64: 1, 128>}, {transform_indices = @transform_6, window_bounds = array<i64: 1, 1, 128>}]} {
    %c0_i32 = arith.constant 0 : i32
    %0 = arith.cmpi eq, %arg1, %c0_i32 : i32
    %1 = arith.extui %0 : i1 to i32
    %c0_i32_0 = arith.constant 0 : i32
    %2 = arith.cmpi ne, %1, %c0_i32_0 : i32
    scf.if %2 {
      %cst_105 = arith.constant 0.000000e+00 : f32
      %87 = vector.broadcast %cst_105 : f32 to vector<1x128xf32>
      %c0_106 = arith.constant 0 : index
      %c0_107 = arith.constant 0 : index
      %88 = vector.load %arg10[%c0_106, %c0_107] : memref<1x128xf32, #tpu.memory_space<vmem>>, vector<1x128xf32>
      tpu.vector_store %arg10[%c0_106, %c0_107], %87 {strides = array<i32>} : memref<1x128xf32, #tpu.memory_space<vmem>>, vector<1x128xf32>,
    } else {
    }
    %c0 = arith.constant 0 : index
    %c0_1 = arith.constant 0 : index
    %c0_2 = arith.constant 0 : index
    %c0_3 = arith.constant 0 : index
    %3 = vector.load %arg2[%c0, %c0_1, %c0_2, %c0_3] : memref<1x1x336x8xf32, #tpu.memory_space<vmem>>, vector<1x1x288x8xf32>
    %4 = vector.shape_cast %3 : vector<1x1x288x8xf32> to vector<288x8xf32>
    %c0_4 = arith.constant 0 : index
    %c0_5 = arith.constant 0 : index
    %c0_6 = arith.constant 0 : index
    %5 = vector.load %arg4[%c0_4, %c0_5, %c0_6] : memref<9x8x128xf32, #tpu.memory_space<vmem>>, vector<1x8x128xf32>
    %6 = vector.shape_cast %5 : vector<1x8x128xf32> to vector<8x128xf32>
    %cst = arith.constant dense<0.000000e+00> : vector<288x128xf32>
    %7 = tpu.matmul %4, %6, %cst {dimension_numbers = #tpu.dot_dimension_numbers<[1], [0], [0], [1], [0, 0, 1, 1], [], []>} : vector<288x8xf32>, vector<8x128xf32>, vector<288x128xf32> -> vector<288x128xf32>
    %c0_7 = arith.constant 0 : index
    %c0_8 = arith.constant 0 : index
    %8 = vector.load %arg9[%c0_7, %c0_8] : memref<288x128xf32, #tpu.memory_space<vmem>>, vector<288x128xf32>
    tpu.vector_store %arg9[%c0_7, %c0_8], %7 {strides = array<i32>} : memref<288x128xf32, #tpu.memory_space<vmem>>, vector<288x128xf32>,
    %c0_9 = arith.constant 0 : index
    %c0_10 = arith.constant 0 : index
    %c1 = arith.constant 1 : index
    %c0_11 = arith.constant 0 : index
    %9 = vector.load %arg2[%c0_9, %c0_10, %c1, %c0_11] : memref<1x1x336x8xf32, #tpu.memory_space<vmem>>, vector<1x1x288x8xf32>
    %10 = vector.shape_cast %9 : vector<1x1x288x8xf32> to vector<288x8xf32>
    %c1_12 = arith.constant 1 : index
    %c0_13 = arith.constant 0 : index
    %c0_14 = arith.constant 0 : index
    %11 = vector.load %arg4[%c1_12, %c0_13, %c0_14] : memref<9x8x128xf32, #tpu.memory_space<vmem>>, vector<1x8x128xf32>
    %12 = vector.shape_cast %11 : vector<1x8x128xf32> to vector<8x128xf32>
    %cst_15 = arith.constant dense<0.000000e+00> : vector<288x128xf32>
    %13 = tpu.matmul %10, %12, %cst_15 {dimension_numbers = #tpu.dot_dimension_numbers<[1], [0], [0], [1], [0, 0, 1, 1], [], []>} : vector<288x8xf32>, vector<8x128xf32>, vector<288x128xf32> -> vector<288x128xf32>
    %c0_16 = arith.constant 0 : index
    %c0_17 = arith.constant 0 : index
    %14 = vector.load %arg9[%c0_16, %c0_17] : memref<288x128xf32, #tpu.memory_space<vmem>>, vector<288x128xf32>
    %15 = arith.addf %14, %13 : vector<288x128xf32>
    %c0_18 = arith.constant 0 : index
    %c0_19 = arith.constant 0 : index
    %16 = vector.load %arg9[%c0_18, %c0_19] : memref<288x128xf32, #tpu.memory_space<vmem>>, vector<288x128xf32>
    tpu.vector_store %arg9[%c0_18, %c0_19], %15 {strides = array<i32>} : memref<288x128xf32, #tpu.memory_space<vmem>>, vector<288x128xf32>,
    %c0_20 = arith.constant 0 : index
    %c0_21 = arith.constant 0 : index
    %c2 = arith.constant 2 : index
    %c0_22 = arith.constant 0 : index
    %17 = vector.load %arg2[%c0_20, %c0_21, %c2, %c0_22] : memref<1x1x336x8xf32, #tpu.memory_space<vmem>>, vector<1x1x288x8xf32>
    %18 = vector.shape_cast %17 : vector<1x1x288x8xf32> to vector<288x8xf32>
    %c2_23 = arith.constant 2 : index
    %c0_24 = arith.constant 0 : index
    %c0_25 = arith.constant 0 : index
    %19 = vector.load %arg4[%c2_23, %c0_24, %c0_25] : memref<9x8x128xf32, #tpu.memory_space<vmem>>, vector<1x8x128xf32>
    %20 = vector.shape_cast %19 : vector<1x8x128xf32> to vector<8x128xf32>
    %cst_26 = arith.constant dense<0.000000e+00> : vector<288x128xf32>
    %21 = tpu.matmul %18, %20, %cst_26 {dimension_numbers = #tpu.dot_dimension_numbers<[1], [0], [0], [1], [0, 0, 1, 1], [], []>} : vector<288x8xf32>, vector<8x128xf32>, vector<288x128xf32> -> vector<288x128xf32>
    %c0_27 = arith.constant 0 : index
    %c0_28 = arith.constant 0 : index
    %22 = vector.load %arg9[%c0_27, %c0_28] : memref<288x128xf32, #tpu.memory_space<vmem>>, vector<288x128xf32>
    %23 = arith.addf %22, %21 : vector<288x128xf32>
    %c0_29 = arith.constant 0 : index
    %c0_30 = arith.constant 0 : index
    %24 = vector.load %arg9[%c0_29, %c0_30] : memref<288x128xf32, #tpu.memory_space<vmem>>, vector<288x128xf32>
    tpu.vector_store %arg9[%c0_29, %c0_30], %23 {strides = array<i32>} : memref<288x128xf32, #tpu.memory_space<vmem>>, vector<288x128xf32>,
    %c0_31 = arith.constant 0 : index
    %c0_32 = arith.constant 0 : index
    %c18 = arith.constant 18 : index
    %c0_33 = arith.constant 0 : index
    %25 = vector.load %arg2[%c0_31, %c0_32, %c18, %c0_33] : memref<1x1x336x8xf32, #tpu.memory_space<vmem>>, vector<1x1x288x8xf32>
    %26 = vector.shape_cast %25 : vector<1x1x288x8xf32> to vector<288x8xf32>
    %c3 = arith.constant 3 : index
    %c0_34 = arith.constant 0 : index
    %c0_35 = arith.constant 0 : index
    %27 = vector.load %arg4[%c3, %c0_34, %c0_35] : memref<9x8x128xf32, #tpu.memory_space<vmem>>, vector<1x8x128xf32>
    %28 = vector.shape_cast %27 : vector<1x8x128xf32> to vector<8x128xf32>
    %cst_36 = arith.constant dense<0.000000e+00> : vector<288x128xf32>
    %29 = tpu.matmul %26, %28, %cst_36 {dimension_numbers = #tpu.dot_dimension_numbers<[1], [0], [0], [1], [0, 0, 1, 1], [], []>} : vector<288x8xf32>, vector<8x128xf32>, vector<288x128xf32> -> vector<288x128xf32>
    %c0_37 = arith.constant 0 : index
    %c0_38 = arith.constant 0 : index
    %30 = vector.load %arg9[%c0_37, %c0_38] : memref<288x128xf32, #tpu.memory_space<vmem>>, vector<288x128xf32>
    %31 = arith.addf %30, %29 : vector<288x128xf32>
    %c0_39 = arith.constant 0 : index
    %c0_40 = arith.constant 0 : index
    %32 = vector.load %arg9[%c0_39, %c0_40] : memref<288x128xf32, #tpu.memory_space<vmem>>, vector<288x128xf32>
    tpu.vector_store %arg9[%c0_39, %c0_40], %31 {strides = array<i32>} : memref<288x128xf32, #tpu.memory_space<vmem>>, vector<288x128xf32>,
    %c0_41 = arith.constant 0 : index
    %c0_42 = arith.constant 0 : index
    %c19 = arith.constant 19 : index
    %c0_43 = arith.constant 0 : index
    %33 = vector.load %arg2[%c0_41, %c0_42, %c19, %c0_43] : memref<1x1x336x8xf32, #tpu.memory_space<vmem>>, vector<1x1x288x8xf32>
    %34 = vector.shape_cast %33 : vector<1x1x288x8xf32> to vector<288x8xf32>
    %c4 = arith.constant 4 : index
    %c0_44 = arith.constant 0 : index
    %c0_45 = arith.constant 0 : index
    %35 = vector.load %arg4[%c4, %c0_44, %c0_45] : memref<9x8x128xf32, #tpu.memory_space<vmem>>, vector<1x8x128xf32>
    %36 = vector.shape_cast %35 : vector<1x8x128xf32> to vector<8x128xf32>
    %cst_46 = arith.constant dense<0.000000e+00> : vector<288x128xf32>
    %37 = tpu.matmul %34, %36, %cst_46 {dimension_numbers = #tpu.dot_dimension_numbers<[1], [0], [0], [1], [0, 0, 1, 1], [], []>} : vector<288x8xf32>, vector<8x128xf32>, vector<288x128xf32> -> vector<288x128xf32>
    %c0_47 = arith.constant 0 : index
    %c0_48 = arith.constant 0 : index
    %38 = vector.load %arg9[%c0_47, %c0_48] : memref<288x128xf32, #tpu.memory_space<vmem>>, vector<288x128xf32>
    %39 = arith.addf %38, %37 : vector<288x128xf32>
    %c0_49 = arith.constant 0 : index
    %c0_50 = arith.constant 0 : index
    %40 = vector.load %arg9[%c0_49, %c0_50] : memref<288x128xf32, #tpu.memory_space<vmem>>, vector<288x128xf32>
    tpu.vector_store %arg9[%c0_49, %c0_50], %39 {strides = array<i32>} : memref<288x128xf32, #tpu.memory_space<vmem>>, vector<288x128xf32>,
    %c0_51 = arith.constant 0 : index
    %c0_52 = arith.constant 0 : index
    %c20 = arith.constant 20 : index
    %c0_53 = arith.constant 0 : index
    %41 = vector.load %arg2[%c0_51, %c0_52, %c20, %c0_53] : memref<1x1x336x8xf32, #tpu.memory_space<vmem>>, vector<1x1x288x8xf32>
    %42 = vector.shape_cast %41 : vector<1x1x288x8xf32> to vector<288x8xf32>
    %c5 = arith.constant 5 : index
    %c0_54 = arith.constant 0 : index
    %c0_55 = arith.constant 0 : index
    %43 = vector.load %arg4[%c5, %c0_54, %c0_55] : memref<9x8x128xf32, #tpu.memory_space<vmem>>, vector<1x8x128xf32>
    %44 = vector.shape_cast %43 : vector<1x8x128xf32> to vector<8x128xf32>
    %cst_56 = arith.constant dense<0.000000e+00> : vector<288x128xf32>
    %45 = tpu.matmul %42, %44, %cst_56 {dimension_numbers = #tpu.dot_dimension_numbers<[1], [0], [0], [1], [0, 0, 1, 1], [], []>} : vector<288x8xf32>, vector<8x128xf32>, vector<288x128xf32> -> vector<288x128xf32>
    %c0_57 = arith.constant 0 : index
    %c0_58 = arith.constant 0 : index
    %46 = vector.load %arg9[%c0_57, %c0_58] : memref<288x128xf32, #tpu.memory_space<vmem>>, vector<288x128xf32>
    %47 = arith.addf %46, %45 : vector<288x128xf32>
    %c0_59 = arith.constant 0 : index
    %c0_60 = arith.constant 0 : index
    %48 = vector.load %arg9[%c0_59, %c0_60] : memref<288x128xf32, #tpu.memory_space<vmem>>, vector<288x128xf32>
    tpu.vector_store %arg9[%c0_59, %c0_60], %47 {strides = array<i32>} : memref<288x128xf32, #tpu.memory_space<vmem>>, vector<288x128xf32>,
    %c0_61 = arith.constant 0 : index
    %c0_62 = arith.constant 0 : index
    %c36 = arith.constant 36 : index
    %c0_63 = arith.constant 0 : index
    %49 = vector.load %arg2[%c0_61, %c0_62, %c36, %c0_63] : memref<1x1x336x8xf32, #tpu.memory_space<vmem>>, vector<1x1x288x8xf32>
    %50 = vector.shape_cast %49 : vector<1x1x288x8xf32> to vector<288x8xf32>
    %c6 = arith.constant 6 : index
    %c0_64 = arith.constant 0 : index
    %c0_65 = arith.constant 0 : index
    %51 = vector.load %arg4[%c6, %c0_64, %c0_65] : memref<9x8x128xf32, #tpu.memory_space<vmem>>, vector<1x8x128xf32>
    %52 = vector.shape_cast %51 : vector<1x8x128xf32> to vector<8x128xf32>
    %cst_66 = arith.constant dense<0.000000e+00> : vector<288x128xf32>
    %53 = tpu.matmul %50, %52, %cst_66 {dimension_numbers = #tpu.dot_dimension_numbers<[1], [0], [0], [1], [0, 0, 1, 1], [], []>} : vector<288x8xf32>, vector<8x128xf32>, vector<288x128xf32> -> vector<288x128xf32>
    %c0_67 = arith.constant 0 : index
    %c0_68 = arith.constant 0 : index
    %54 = vector.load %arg9[%c0_67, %c0_68] : memref<288x128xf32, #tpu.memory_space<vmem>>, vector<288x128xf32>
    %55 = arith.addf %54, %53 : vector<288x128xf32>
    %c0_69 = arith.constant 0 : index
    %c0_70 = arith.constant 0 : index
    %56 = vector.load %arg9[%c0_69, %c0_70] : memref<288x128xf32, #tpu.memory_space<vmem>>, vector<288x128xf32>
    tpu.vector_store %arg9[%c0_69, %c0_70], %55 {strides = array<i32>} : memref<288x128xf32, #tpu.memory_space<vmem>>, vector<288x128xf32>,
    %c0_71 = arith.constant 0 : index
    %c0_72 = arith.constant 0 : index
    %c37 = arith.constant 37 : index
    %c0_73 = arith.constant 0 : index
    %57 = vector.load %arg2[%c0_71, %c0_72, %c37, %c0_73] : memref<1x1x336x8xf32, #tpu.memory_space<vmem>>, vector<1x1x288x8xf32>
    %58 = vector.shape_cast %57 : vector<1x1x288x8xf32> to vector<288x8xf32>
    %c7 = arith.constant 7 : index
    %c0_74 = arith.constant 0 : index
    %c0_75 = arith.constant 0 : index
    %59 = vector.load %arg4[%c7, %c0_74, %c0_75] : memref<9x8x128xf32, #tpu.memory_space<vmem>>, vector<1x8x128xf32>
    %60 = vector.shape_cast %59 : vector<1x8x128xf32> to vector<8x128xf32>
    %cst_76 = arith.constant dense<0.000000e+00> : vector<288x128xf32>
    %61 = tpu.matmul %58, %60, %cst_76 {dimension_numbers = #tpu.dot_dimension_numbers<[1], [0], [0], [1], [0, 0, 1, 1], [], []>} : vector<288x8xf32>, vector<8x128xf32>, vector<288x128xf32> -> vector<288x128xf32>
    %c0_77 = arith.constant 0 : index
    %c0_78 = arith.constant 0 : index
    %62 = vector.load %arg9[%c0_77, %c0_78] : memref<288x128xf32, #tpu.memory_space<vmem>>, vector<288x128xf32>
    %63 = arith.addf %62, %61 : vector<288x128xf32>
    %c0_79 = arith.constant 0 : index
    %c0_80 = arith.constant 0 : index
    %64 = vector.load %arg9[%c0_79, %c0_80] : memref<288x128xf32, #tpu.memory_space<vmem>>, vector<288x128xf32>
    tpu.vector_store %arg9[%c0_79, %c0_80], %63 {strides = array<i32>} : memref<288x128xf32, #tpu.memory_space<vmem>>, vector<288x128xf32>,
    %c0_81 = arith.constant 0 : index
    %c0_82 = arith.constant 0 : index
    %c38 = arith.constant 38 : index
    %c0_83 = arith.constant 0 : index
    %65 = vector.load %arg2[%c0_81, %c0_82, %c38, %c0_83] : memref<1x1x336x8xf32, #tpu.memory_space<vmem>>, vector<1x1x288x8xf32>
    %66 = vector.shape_cast %65 : vector<1x1x288x8xf32> to vector<288x8xf32>
    %c8 = arith.constant 8 : index
    %c0_84 = arith.constant 0 : index
    %c0_85 = arith.constant 0 : index
    %67 = vector.load %arg4[%c8, %c0_84, %c0_85] : memref<9x8x128xf32, #tpu.memory_space<vmem>>, vector<1x8x128xf32>
    %68 = vector.shape_cast %67 : vector<1x8x128xf32> to vector<8x128xf32>
    %cst_86 = arith.constant dense<0.000000e+00> : vector<288x128xf32>
    %69 = tpu.matmul %66, %68, %cst_86 {dimension_numbers = #tpu.dot_dimension_numbers<[1], [0], [0], [1], [0, 0, 1, 1], [], []>} : vector<288x8xf32>, vector<8x128xf32>, vector<288x128xf32> -> vector<288x128xf32>
    %c0_87 = arith.constant 0 : index
    %c0_88 = arith.constant 0 : index
    %70 = vector.load %arg9[%c0_87, %c0_88] : memref<288x128xf32, #tpu.memory_space<vmem>>, vector<288x128xf32>
    %71 = arith.addf %70, %69 : vector<288x128xf32>
    %c0_89 = arith.constant 0 : index
    %c0_90 = arith.constant 0 : index
    %72 = vector.load %arg9[%c0_89, %c0_90] : memref<288x128xf32, #tpu.memory_space<vmem>>, vector<288x128xf32>
    tpu.vector_store %arg9[%c0_89, %c0_90], %71 {strides = array<i32>} : memref<288x128xf32, #tpu.memory_space<vmem>>, vector<288x128xf32>,
    %c0_91 = arith.constant 0 : index
    %c0_92 = arith.constant 0 : index
    %73 = vector.load %arg9[%c0_91, %c0_92] : memref<288x128xf32, #tpu.memory_space<vmem>>, vector<288x128xf32>
    %c0_93 = arith.constant 0 : index
    %c0_94 = arith.constant 0 : index
    %74 = vector.load %arg5[%c0_93, %c0_94] : memref<1x128xf32, #tpu.memory_space<vmem>>, vector<1x128xf32>
    %75 = vector.broadcast %74 : vector<1x128xf32> to vector<288x128xf32>
    %76 = arith.addf %73, %75 : vector<288x128xf32>
    %cst_95 = arith.constant 0.000000e+00 : f32
    %77 = vector.broadcast %cst_95 : f32 to vector<288x128xf32>
    %78 = arith.maximumf %76, %77 : vector<288x128xf32>
    %c0_96 = arith.constant 0 : index
    %c0_97 = arith.constant 0 : index
    %79 = vector.load %arg10[%c0_96, %c0_97] : memref<1x128xf32, #tpu.memory_space<vmem>>, vector<1x128xf32>
    %c0_98 = arith.constant 0 : index
    %c0_99 = arith.constant 0 : index
    %80 = vector.load %arg3[%c0_98, %c0_99] : memref<1x288xf32, #tpu.memory_space<vmem>>, vector<1x288xf32>
    %cst_100 = arith.constant dense<0.000000e+00> : vector<1x128xf32>
    %81 = tpu.matmul %80, %78, %cst_100 {dimension_numbers = #tpu.dot_dimension_numbers<[1], [0], [0], [1], [0, 0, 1, 1], [], []>} : vector<1x288xf32>, vector<288x128xf32>, vector<1x128xf32> -> vector<1x128xf32>
    %82 = arith.addf %79, %81 : vector<1x128xf32>
    %c0_101 = arith.constant 0 : index
    %c0_102 = arith.constant 0 : index
    %83 = vector.load %arg10[%c0_101, %c0_102] : memref<1x128xf32, #tpu.memory_space<vmem>>, vector<1x128xf32>
    tpu.vector_store %arg10[%c0_101, %c0_102], %82 {strides = array<i32>} : memref<1x128xf32, #tpu.memory_space<vmem>>, vector<1x128xf32>,
    %c0_i32_103 = arith.constant 0 : i32
    %84 = arith.cmpi eq, %arg1, %c0_i32_103 : i32
    %85 = arith.extui %84 : i1 to i32
    %c0_i32_104 = arith.constant 0 : i32
    %86 = arith.cmpi ne, %85, %c0_i32_104 : i32
    scf.if %86 {
      %c0_105 = arith.constant 0 : index
      %c0_106 = arith.constant 0 : index
      %87 = vector.load %arg10[%c0_105, %c0_106] : memref<1x128xf32, #tpu.memory_space<vmem>>, vector<1x128xf32>
      %c0_107 = arith.constant 0 : index
      %c0_108 = arith.constant 0 : index
      %88 = vector.load %arg6[%c0_107, %c0_108] : memref<128x128xf32, #tpu.memory_space<vmem>>, vector<128x128xf32>
      %cst_109 = arith.constant dense<0.000000e+00> : vector<1x128xf32>
      %89 = tpu.matmul %87, %88, %cst_109 {dimension_numbers = #tpu.dot_dimension_numbers<[1], [0], [0], [1], [0, 0, 1, 1], [], []>} : vector<1x128xf32>, vector<128x128xf32>, vector<1x128xf32> -> vector<1x128xf32>
      %c0_110 = arith.constant 0 : index
      %c0_111 = arith.constant 0 : index
      %90 = vector.load %arg7[%c0_110, %c0_111] : memref<1x128xf32, #tpu.memory_space<vmem>>, vector<1x128xf32>
      %91 = arith.addf %89, %90 : vector<1x128xf32>
      %c0_112 = arith.constant 0 : index
      %c0_113 = arith.constant 0 : index
      %c0_114 = arith.constant 0 : index
      %92 = vector.load %arg8[%c0_112, %c0_113, %c0_114] : memref<1x1x128xf32, #tpu.memory_space<vmem>>, vector<1x1x128xf32>
      %93 = vector.shape_cast %92 : vector<1x1x128xf32> to vector<1x128xf32>
      %94 = vector.shape_cast %91 : vector<1x128xf32> to vector<1x1x128xf32>
      tpu.vector_store %arg8[%c0_112, %c0_113, %c0_114], %94 {strides = array<i32>} : memref<1x1x128xf32, #tpu.memory_space<vmem>>, vector<1x1x128xf32>,
    } else {
    }
    return
  }
  func.func @transform_0(%arg0: i32, %arg1: i32) -> (i32, i32, i32, i32) {
    %c0_i32 = arith.constant 0 : i32
    %c0_i32_0 = arith.constant 0 : i32
    %c0_i32_1 = arith.constant 0 : i32
    return %arg0, %arg1, %c0_i32, %c0_i32_0 : i32, i32, i32, i32
  }
  func.func @transform_1(%arg0: i32, %arg1: i32) -> (i32, i32) {
    %c0_i32 = arith.constant 0 : i32
    %c0_i32_0 = arith.constant 0 : i32
    %c0_i32_1 = arith.constant 0 : i32
    return %c0_i32, %c0_i32_0 : i32, i32
  }
  func.func @transform_2(%arg0: i32, %arg1: i32) -> (i32, i32, i32) {
    %c0_i32 = arith.constant 0 : i32
    %c0_i32_0 = arith.constant 0 : i32
    %c0_i32_1 = arith.constant 0 : i32
    %c0_i32_2 = arith.constant 0 : i32
    return %c0_i32, %c0_i32_0, %c0_i32_1 : i32, i32, i32
  }
  func.func @transform_3(%arg0: i32, %arg1: i32) -> (i32, i32) {
    %c0_i32 = arith.constant 0 : i32
    %c0_i32_0 = arith.constant 0 : i32
    %c0_i32_1 = arith.constant 0 : i32
    return %c0_i32, %c0_i32_0 : i32, i32
  }
  func.func @transform_4(%arg0: i32, %arg1: i32) -> (i32, i32) {
    %c0_i32 = arith.constant 0 : i32
    %c0_i32_0 = arith.constant 0 : i32
    %c0_i32_1 = arith.constant 0 : i32
    return %c0_i32, %c0_i32_0 : i32, i32
  }
  func.func @transform_5(%arg0: i32, %arg1: i32) -> (i32, i32) {
    %c0_i32 = arith.constant 0 : i32
    %c0_i32_0 = arith.constant 0 : i32
    %c0_i32_1 = arith.constant 0 : i32
    return %c0_i32, %c0_i32_0 : i32, i32
  }
  func.func @transform_6(%arg0: i32, %arg1: i32) -> (i32, i32, i32) {
    %c0_i32 = arith.constant 0 : i32
    %c0_i32_0 = arith.constant 0 : i32
    %c0_i32_1 = arith.constant 0 : i32
    return %arg0, %c0_i32, %c0_i32_0 : i32, i32, i32
  }
}

</mosaic_0001>

<bundles_post_ra>
// kernel: fused_conv_relu_pool_linear.1
= control target key start
LH: loop header
LB: loop body
LE: loop exit
PB: predicated region body
PF: predicated region fallthrough
CT: control target
= control target key end

     0   :  { %11 = vsyncpa [#allocation5], 0  ;;  %s5899_s0 = inlined_call_operand.vmem [shape: f32[2,1,336,8], index: 0, kind: input, shape index: {}]   ;;  %s5900_s1 = inlined_call_operand.vmem [shape: f32[1,288], index: 1, kind: input, shape index: {}]   ;;  %s5901_s2 = inlined_call_operand.vmem [shape: f32[9,8,128], index: 2, kind: input, shape index: {}]   ;;  %s5902_s3 = inlined_call_operand.vmem [shape: f32[1,128], index: 3, kind: input, shape index: {}]   ;;  %s5903_s4 = inlined_call_operand.vmem [shape: f32[128,128], index: 4, kind: input, shape index: {}]   ;;  %s5904_s5 = inlined_call_operand.vmem [shape: f32[1,128], index: 5, kind: input, shape index: {}]   ;;  %s5905_s6 = inlined_call_operand.hbm [shape: f32[2,1,128], index: 6, kind: output, shape index: {}]  }
   0x1   :  { %13 = vsyncpa [#allocation5 + $0x1], 0  ;;  %s4449_s21 = smov 0   ;;  %s4451_s22 = smov 0  }
   0x2   :  { %s4453_s23 = smov 0   ;;  %s4455_s24 = smov 0  }
   0x3   :  { %s4457_s25 = smov 0   ;;  %s4459_s26 = smov 0  }
   0x4 LB: > { %s3931_s27 = sadd.s32 4294967295, %s4411_s26   ;;  %s3932_s28 = sadd.s32 4294967294, %s4411_s26   ;;  %s4411_s26 = sphi %s4459_s26, %s19_s26   ;;  %s4407_s25 = sphi %s4457_s25, %s6006_s25   ;;  %s4403_s24 = sphi %s4455_s24, %s6005_s24   ;;  %s4399_s23 = sphi %s4453_s23, %s6004_s23   ;;  %s4395_s22 = sphi %s4451_s22, %s6003_s22   ;;  %s4391_s21 = sphi %s4449_s21, %s6002_s21  }
   0x5   : > { %s31_s29 = sadd.s32 1, %s4407_s25  ;;  %s171_s30 = sadd.s32 1, %s4399_s23 }
   0x6   : > { %p33_p0 = scmp.ge.s32.totalorder %s31_s29, 2  ;;  %p181_p1 = scmp.ne.s32.totalorder %s4399_s23, %s4395_s22 }
   0x7   : > { %p182_p2 = scmp.eq.s32.totalorder %s3931_s27, 1  ;;  %p187_p3 = scmp.ne.s32.totalorder %s4395_s22, %s4391_s21 }
   0x8   : > { %s6008_s29 = smov (%p33_p0, %s31_s29), 0  ;;  %p188_p5 = scmp.eq.s32.totalorder %s3932_s28, 1 }
   0x9   : > { %p4489_p4 = por %p182_p2, %p181_p1  ;;  %s168_s8 = ssub.s32 %s4407_s25, %s6008_s29 }
   0xa   : > { %p3935_p6 = scmp.ge.s32.totalorder %s4411_s26, 1  ;;  %p169_p7 = scmp.eq.s32.totalorder %s168_s8, 0 }
   0xb   : > { %p4496_p8 = por %p188_p5, %p187_p3  ;;  %p233_p9 = scmp.lt.s32.totalorder %s4411_s26, 3 }
   0xc   : > { %s4502_s10 = scalar_select %p169_p7, %s4399_s23, %s171_s30  }
   0xd   : > { %p234_p10 = pnand %p3935_p6, %p233_p9 }
   0xf   : > { %237 = sbr.rel (%p234_p10) target bundleno = 1100 (0x44c), region = 44 }
  0x14   : > { %v316_v0 = vld [vmem:[%s5901_s2] sm:$0xff]  ;;  %p266_p11 = scmp.lt.s32.totalorder %s4403_s24, 1  ;;  %vm317_vm0 = vcmask 64512   ;;  %v3973_v7 = vld [vmem:[%s5901_s2 + $0x8] sm:$0xff]  ;;  %v4010_v26 = vld [vmem:[%s5901_s2 + $0x10] sm:$0xff]  ;;  %vm3739_vm1 = vcmask 261120   ;;  %s3855_s18 = scalar_lea.hbm %s5905_s6, %s4403_s24 }
  0x15   : > { %4272 = vmatpush.msra.mxu1 %v316_v0  ;;  %4273 = vmatpush.msra.mxu2 %v316_v0  ;;  %v4047_v31 = vld [vmem:[%s5901_s2 + $0x18] sm:$0xff]  ;;  %v4084_v36 = vld [vmem:[%s5901_s2 + $0x20] sm:$0xff] }
  0x16   : > { %s267_s13 = scalar_select %p266_p11, %s4403_s24, 1  ;;  %441 = vmatpush.msra.mxu0 %v316_v0  ;;  %4274 = vmatpush.msra.mxu3 %v316_v0 }
  0x17   : > { %748 = vmatpush.msrb.mxu1 %v3973_v7  ;;  %1127 = vmatpush.msrb.mxu2 %v4010_v26 }
  0x18   : > { %s4275_s14 = smul.u32 336, %s267_s13  ;;  %1506 = vmatpush.msrb.mxu3 %v4047_v31  ;;  %1885 = vmatpush.msrb.mxu0 %v4084_v36  ;;  %s4353_s13 = scalar_lea.hbm %s5905_s6, 2 }
  0x1a   : > { %s4512_s17 = scalar_lea.vmem %s5899_s0, %s4275_s14  ;;  %s264_s14 = sand.u32 1, %s4395_s22  }
  0x1b   : > { %v291_v1 = vld [vmem:[%s4512_s17 + $0x58] sm:$0xff]  ;;  %v296_v2 = vld [vmem:[%s4512_s17 + $0x80] sm:$0xff]  ;;  %v306_v4 = vld [vmem:[%s4512_s17 + $0xd0] sm:$0xff]  ;;  %s265_s27 = scalar_lea.vmem [#allocation4], %s264_s14  ;;  %s3847_s30 = scalar_lea.sflag [#allocation5], %s264_s14 }
  0x1c   : > { %v280_v3 = vld [vmem:[%s4512_s17] sm:$0xff]  ;;  %3948 = vmatmul.msk.f32.vlgmr.msra.gmra.mxu1 %vm317_vm0, %v291_v1  ;;  %3953 = vmatmul.msk.f32.vlgmr.msra.gmra.mxu2 %vm317_vm0, %v296_v2  ;;  %v297_v6 = vld [vmem:[%s4512_s17 + $0x88] sm:$0xff]  ;;  %v307_v9 = vld [vmem:[%s4512_s17 + $0xd8] sm:$0xff]  ;;  %s3857_s28 = sshll.u32 %s265_s27, 4  ;;  %s3858_s28 = int_to_ptr.vmem [resolvable:$true] %s3857_s28 }
  0x1d   : > { %3937 = vmatmul.msk.f32.vlgmr.msra.gmra.mxu0 %vm317_vm0, %v280_v3  ;;  %3963 = vmatmul.msk.f32.vlgmr.msra.gmra.mxu3 %vm317_vm0, %v306_v4  ;;  %v292_v5 = vld [vmem:[%s4512_s17 + $0x60] sm:$0xff]  ;;  %v281_v8 = vld [vmem:[%s4512_s17 + $0x8] sm:$0xff]  ;;  %v298_v11 = vld [vmem:[%s4512_s17 + $0x90] sm:$0xff] }
  0x1e   : > { %v293_v10 = vld [vmem:[%s4512_s17 + $0x68] sm:$0xff]  ;;  %v282_v12 = vld [vmem:[%s4512_s17 + $0x10] sm:$0xff]  ;;  %v308_v13 = vld [vmem:[%s4512_s17 + $0xe0] sm:$0xff] }
  0x1f   : > { %v294_v14 = vld [vmem:[%s4512_s17 + $0x70] sm:$0xff]  ;;  %v299_v15 = vld [vmem:[%s4512_s17 + $0x98] sm:$0xff]  ;;  %v309_v17 = vld [vmem:[%s4512_s17 + $0xe8] sm:$0xff] }
  0x20   : > { %v283_v16 = vld [vmem:[%s4512_s17 + $0x18] sm:$0xff]  ;;  %v300_v19 = vld [vmem:[%s4512_s17 + $0xa0] sm:$0xff]  ;;  %v310_v21 = vld [vmem:[%s4512_s17 + $0xf0] sm:$0xff] }
  0x21   : > { %v295_v18 = vld [vmem:[%s4512_s17 + $0x78] sm:$0xff]  ;;  %v284_v20 = vld [vmem:[%s4512_s17 + $0x20] sm:$0xff]  ;;  %v301_v22 = vld [vmem:[%s4512_s17 + $0xa8] sm:$0xff] }
  0x22   : > { %v587_v23 = vld [vmem:[%s4512_s17 + $0x1] sm:$0xff]  ;;  %v311_v25 = vld [vmem:[%s4512_s17 + $0xf8] sm:$0xff]  ;;  %v302_v27 = vld [vmem:[%s4512_s17 + $0xb0] sm:$0xff] }
  0x23   : > { %v285_v24 = vld [vmem:[%s4512_s17 + $0x28] sm:$0xff]  ;;  %v286_v29 = vld [vmem:[%s4512_s17 + $0x30] sm:$0xff]  ;;  %v312_v30 = vld [vmem:[%s4512_s17 + $0x100] sm:$0xff] }
  0x24   : > { %3949 = vmatmul.msk.f32.gmra.mxu1 %vm317_vm0, %v292_v5  ;;  %3954 = vmatmul.msk.f32.gmra.mxu2 %vm317_vm0, %v297_v6  ;;  %v588_v28 = vld [vmem:[%s4512_s17 + $0x9] sm:$0xff]  ;;  %v303_v32 = vld [vmem:[%s4512_s17 + $0xb8] sm:$0xff]  ;;  %v304_v37 = vld [vmem:[%s4512_s17 + $0xc0] sm:$0xff] }
  0x25   : > { %3938 = vmatmul.msk.f32.gmra.mxu0 %vm317_vm0, %v281_v8  ;;  %3964 = vmatmul.msk.f32.gmra.mxu3 %vm317_vm0, %v307_v9  ;;  %v589_v33 = vld [vmem:[%s4512_s17 + $0x11] sm:$0xff]  ;;  %v313_v35 = vld [vmem:[%s4512_s17 + $0x108] sm:$0xff]  ;;  %v590_v38 = vld [vmem:[%s4512_s17 + $0x19] sm:$0xff] }
  0x26   : > { %v287_v34 = vld [vmem:[%s4512_s17 + $0x38] sm:$0xff]  ;;  %v288_v39 = vld [vmem:[%s4512_s17 + $0x40] sm:$0xff]  ;;  %v314_v40 = vld [vmem:[%s4512_s17 + $0x110] sm:$0xff] }
  0x27   : > { %v305_v41 = vld [vmem:[%s4512_s17 + $0xc8] sm:$0xff]  ;;  %v315_v44 = vld [vmem:[%s4512_s17 + $0x118] sm:$0xff]  ;;  %v290_v47 = vld [vmem:[%s4512_s17 + $0x50] sm:$0xff] }
  0x28   : > { %v591_v42 = vld [vmem:[%s4512_s17 + $0x21] sm:$0xff]  ;;  %v592_v45 = vld [vmem:[%s4512_s17 + $0x29] sm:$0xff]  ;;  %v1345_v48 = vld [vmem:[%s4512_s17 + $0x12] sm:$0xff] }
  0x29   : > { %v289_v43 = vld [vmem:[%s4512_s17 + $0x48] sm:$0xff]  ;;  %v593_v49 = vld [vmem:[%s4512_s17 + $0x31] sm:$0xff]  ;;  %v1346_v51 = vld [vmem:[%s4512_s17 + $0x1a] sm:$0xff] }
  0x2a   : > { %v966_v46 = vld [vmem:[%s4512_s17 + $0x2] sm:$0xff]  ;;  %v967_v50 = vld [vmem:[%s4512_s17 + $0xa] sm:$0xff]  ;;  %v1724_v52 = vld [vmem:[%s4512_s17 + $0x13] sm:$0xff] }
  0x2b   : > { %v594_v53 = vld [vmem:[%s4512_s17 + $0x39] sm:$0xff]  ;;  %v1347_v54 = vld [vmem:[%s4512_s17 + $0x22] sm:$0xff]  ;;  %v1348_v57 = vld [vmem:[%s4512_s17 + $0x2a] sm:$0xff] }
  0x2c   : > { %3950 = vmatmul.msk.f32.gmra.mxu1 %vm317_vm0, %v293_v10  ;;  %3955 = vmatmul.msk.f32.gmra.mxu2 %vm317_vm0, %v298_v11  ;;  %v1725_v55 = vld [vmem:[%s4512_s17 + $0x1b] sm:$0xff]  ;;  %v1726_v58 = vld [vmem:[%s4512_s17 + $0x23] sm:$0xff]  ;;  %v1349_v60 = vld [vmem:[%s4512_s17 + $0x32] sm:$0xff] }
  0x2d   : > { %3939 = vmatmul.msk.f32.gmra.mxu0 %vm317_vm0, %v282_v12  ;;  %3965 = vmatmul.msk.f32.gmra.mxu3 %vm317_vm0, %v308_v13  ;;  %v595_v56 = vld [vmem:[%s4512_s17 + $0x41] sm:$0xff]  ;;  %v596_v59 = vld [vmem:[%s4512_s17 + $0x49] sm:$0xff]  ;;  %v597_v62 = vld [vmem:[%s4512_s17 + $0x51] sm:$0xff] }
  0x2e   : > { %v1727_v61 = vld [vmem:[%s4512_s17 + $0x2b] sm:$0xff]  ;;  %v1350_v63 = vld [vmem:[%s4512_s17 + $0x3a] sm:$0xff]  ;;  %v1351_v4 = vld [vmem:[%s4512_s17 + $0x42] sm:$0xff] }
  0x2f   : > { %v1728_v0 = vld [vmem:[%s4512_s17 + $0x33] sm:$0xff]  ;;  %v1729_v5 = vld [vmem:[%s4512_s17 + $0x3b] sm:$0xff]  ;;  %v1352_v11 = vld [vmem:[%s4512_s17 + $0x4a] sm:$0xff] }
  0x30   : > { %v598_v2 = vld [vmem:[%s4512_s17 + $0x59] sm:$0xff]  ;;  %v599_v9 = vld [vmem:[%s4512_s17 + $0x61] sm:$0xff] }
  0x31   : > { %v1730_v12 = vld [vmem:[%s4512_s17 + $0x43] sm:$0xff]  ;;  %v1732_v26 = vld [vmem:[%s4512_s17 + $0x53] sm:$0xff] }
  0x34   : > { %3951 = vmatmul.msk.f32.gmra.mxu1 %vm317_vm0, %v294_v14  ;;  %3956 = vmatmul.msk.f32.gmra.mxu2 %vm317_vm0, %v299_v15 }
  0x35   : > { %3940 = vmatmul.msk.f32.gmra.mxu0 %vm317_vm0, %v283_v16  ;;  %3966 = vmatmul.msk.f32.gmra.mxu3 %vm317_vm0, %v309_v17  ;;  %v600_v16 = vld [vmem:[%s4512_s17 + $0x69] sm:$0xff] }
  0x3c   : > { %3952 = vmatmul.msk.f32.gmra.mxu1 %vm317_vm0, %v295_v18  ;;  %3957 = vmatmul.msk.f32.gmra.mxu2 %vm317_vm0, %v300_v19  ;;  %v1353_v18 = vld [vmem:[%s4512_s17 + $0x52] sm:$0xff] }
  0x3d   : > { %3941 = vmatmul.msk.f32.gmra.mxu0 %vm317_vm0, %v284_v20  ;;  %3967 = vmatmul.msk.f32.gmra.mxu3 %vm317_vm0, %v310_v21  ;;  %v1731_v19 = vld [vmem:[%s4512_s17 + $0x4b] sm:$0xff] }
  0x44   : > { %3958 = vmatmul.msk.f32.gmra.mxu2 %vm317_vm0, %v301_v22  ;;  %3974 = vmatmul.msk.f32.vlgmr.msrb.gmra.mxu1 %vm317_vm0, %v587_v23  ;;  %v601_v23 = vld [vmem:[%s4512_s17 + $0x71] sm:$0xff] }
  0x45   : > { %3942 = vmatmul.msk.f32.gmra.mxu0 %vm317_vm0, %v285_v24  ;;  %3968 = vmatmul.msk.f32.gmra.mxu3 %vm317_vm0, %v311_v25  ;;  %v1354_v25 = vld [vmem:[%s4512_s17 + $0x5a] sm:$0xff] }
  0x4c   : > { %3959 = vmatmul.msk.f32.gmra.mxu2 %vm317_vm0, %v302_v27  ;;  %3975 = vmatmul.msk.f32.gmra.mxu1 %vm317_vm0, %v588_v28 }
  0x4d   : > { %3943 = vmatmul.msk.f32.gmra.mxu0 %vm317_vm0, %v286_v29  ;;  %3969 = vmatmul.msk.f32.gmra.mxu3 %vm317_vm0, %v312_v30  ;;  %v602_v30 = vld [vmem:[%s4512_s17 + $0x79] sm:$0xff] }
  0x54   : > { %3960 = vmatmul.msk.f32.gmra.mxu2 %vm317_vm0, %v303_v32  ;;  %3976 = vmatmul.msk.f32.gmra.mxu1 %vm317_vm0, %v589_v33  ;;  %v1355_v32 = vld [vmem:[%s4512_s17 + $0x62] sm:$0xff] }
  0x55   : > { %3944 = vmatmul.msk.f32.gmra.mxu0 %vm317_vm0, %v287_v34  ;;  %3970 = vmatmul.msk.f32.gmra.mxu3 %vm317_vm0, %v313_v35  ;;  %v1733_v33 = vld [vmem:[%s4512_s17 + $0x5b] sm:$0xff] }
  0x5c   : > { %3961 = vmatmul.msk.f32.gmra.mxu2 %vm317_vm0, %v304_v37  ;;  %3977 = vmatmul.msk.f32.gmra.mxu1 %vm317_vm0, %v590_v38  ;;  %v603_v37 = vld [vmem:[%s4512_s17 + $0x81] sm:$0xff] }
  0x5d   : > { %3945 = vmatmul.msk.f32.gmra.mxu0 %vm317_vm0, %v288_v39  ;;  %3971 = vmatmul.msk.f32.gmra.mxu3 %vm317_vm0, %v314_v40  ;;  %v1356_v39 = vld [vmem:[%s4512_s17 + $0x6a] sm:$0xff] }
  0x5e   : > { %v1734_v40 = vld [vmem:[%s4512_s17 + $0x63] sm:$0xff] }
  0x64   : > { %3962 = vmatmul.msk.f32.gmra.mxu2 %vm317_vm0, %v305_v41  ;;  %3978 = vmatmul.msk.f32.gmra.mxu1 %vm317_vm0, %v591_v42 }
  0x65   : > { %3946 = vmatmul.msk.f32.gmra.mxu0 %vm317_vm0, %v289_v43  ;;  %3972 = vmatmul.msk.f32.gmra.mxu3 %vm317_vm0, %v315_v44  ;;  %v604_v44 = vld [vmem:[%s4512_s17 + $0x89] sm:$0xff] }
  0x6c   : > { %3979 = vmatmul.msk.f32.gmra.mxu1 %vm317_vm0, %v592_v45  ;;  %4011 = vmatmul.msk.f32.vlgmr.msrb.gmra.mxu2 %vm317_vm0, %v966_v46  ;;  %v1357_v46 = vld [vmem:[%s4512_s17 + $0x72] sm:$0xff] }
  0x6d   : > { %3947 = vmatmul.msk.f32.gmra.mxu0 %vm317_vm0, %v290_v47  ;;  %4048 = vmatmul.msk.f32.vlgmr.msrb.gmra.mxu3 %vm317_vm0, %v1345_v48  ;;  %v1735_v47 = vld [vmem:[%s4512_s17 + $0x6b] sm:$0xff] }
  0x74   : > { %3980 = vmatmul.msk.f32.gmra.mxu1 %vm317_vm0, %v593_v49  ;;  %4012 = vmatmul.msk.f32.gmra.mxu2 %vm317_vm0, %v967_v50 }
  0x75   : > { %4049 = vmatmul.msk.f32.gmra.mxu3 %vm317_vm0, %v1346_v51  ;;  %4085 = vmatmul.msk.f32.vlgmr.msrb.gmra.mxu0 %vm317_vm0, %v1724_v52 }
  0x7c   : > { %3981 = vmatmul.msk.f32.gmra.mxu1 %vm317_vm0, %v594_v53  ;;  %4013 = vmatmul.msk.f32.gmra.mxu2 %vm317_vm0, %v1345_v48  ;;  %v1358_v53 = vld [vmem:[%s4512_s17 + $0x7a] sm:$0xff] }
  0x7d   : > { %4050 = vmatmul.msk.f32.gmra.mxu3 %vm317_vm0, %v1347_v54  ;;  %4086 = vmatmul.msk.f32.gmra.mxu0 %vm317_vm0, %v1725_v55 }
  0x84   : > { %3982 = vmatmul.msk.f32.gmra.mxu1 %vm317_vm0, %v595_v56  ;;  %4014 = vmatmul.msk.f32.gmra.mxu2 %vm317_vm0, %v1346_v51  ;;  %v605_v51 = vld [vmem:[%s4512_s17 + $0x91] sm:$0xff] }
  0x85   : > { %4051 = vmatmul.msk.f32.gmra.mxu3 %vm317_vm0, %v1348_v57  ;;  %4087 = vmatmul.msk.f32.gmra.mxu0 %vm317_vm0, %v1726_v58  ;;  %v606_v58 = vld [vmem:[%s4512_s17 + $0x99] sm:$0xff] }
  0x8c   : > { %3983 = vmatmul.msk.f32.gmra.mxu1 %vm317_vm0, %v596_v59  ;;  %4015 = vmatmul.msk.f32.gmra.mxu2 %vm317_vm0, %v1347_v54  ;;  %v1736_v54 = vld [vmem:[%s4512_s17 + $0x73] sm:$0xff] }
  0x8d   : > { %4052 = vmatmul.msk.f32.gmra.mxu3 %vm317_vm0, %v1349_v60  ;;  %4088 = vmatmul.msk.f32.gmra.mxu0 %vm317_vm0, %v1727_v61  ;;  %v1737_v61 = vld [vmem:[%s4512_s17 + $0x7b] sm:$0xff] }
  0x94   : > { %3984 = vmatmul.msk.f32.gmra.mxu1 %vm317_vm0, %v597_v62  ;;  %4016 = vmatmul.msk.f32.gmra.mxu2 %vm317_vm0, %v1348_v57 }
  0x95   : > { %4053 = vmatmul.msk.f32.gmra.mxu3 %vm317_vm0, %v1350_v63  ;;  %4089 = vmatmul.msk.f32.gmra.mxu0 %vm317_vm0, %v1728_v0 }
  0x99   : > { %v4650_v1 = vpop.f32.mrf.mxu1 }
  0x9a   : > { %v4653_v3 = vpop.f32.mrf.mxu0 }
  0x9c   : > { %3985 = vmatmul.msk.f32.gmra.mxu1 %vm317_vm0, %v598_v2  ;;  %4017 = vmatmul.msk.f32.gmra.mxu2 %vm317_vm0, %v1349_v60  ;;  %v1359_v60 = vld [vmem:[%s4512_s17 + $0x82] sm:$0xff] }
  0x9d   : > { %4054 = vmatmul.msk.f32.gmra.mxu3 %vm317_vm0, %v1351_v4  ;;  %4090 = vmatmul.msk.f32.gmra.mxu0 %vm317_vm0, %v1729_v5  ;;  %v607_v2 = vld [vmem:[%s4512_s17 + $0xa1] sm:$0xff]  ;;  %v1360_v5 = vld [vmem:[%s4512_s17 + $0x8a] sm:$0xff] }
  0x9f   : > { %v4661_v6 = vpop.f32.mrf.mxu2 }
  0xa0   : > { %v4663_v7 = vpop.f32.mrf.mxu3 }
  0xa1   : > { %v4665_v8 = vpop.f32.mrf.mxu1 }
  0xa2   : > { %v4668_v10 = vpop.f32.mrf.mxu0 }
  0xa4   : > { %3986 = vmatmul.msk.f32.gmra.mxu1 %vm317_vm0, %v599_v9  ;;  %4018 = vmatmul.msk.f32.gmra.mxu2 %vm317_vm0, %v1350_v63  ;;  %v1738_v9 = vld [vmem:[%s4512_s17 + $0x83] sm:$0xff] }
  0xa5   : > { %4055 = vmatmul.msk.f32.gmra.mxu3 %vm317_vm0, %v1352_v11  ;;  %4091 = vmatmul.msk.f32.gmra.mxu0 %vm317_vm0, %v1730_v12 }
  0xa7   : > { %v4676_v13 = vpop.f32.mrf.mxu2 }
  0xa8   : > { %v4678_v14 = vpop.f32.mrf.mxu3 }
  0xa9   : > { %v4680_v15 = vpop.f32.mrf.mxu1 }
  0xaa   : > { %v4683_v17 = vpop.f32.mrf.mxu0 }
  0xac   : > { %3987 = vmatmul.msk.f32.gmra.mxu1 %vm317_vm0, %v600_v16  ;;  %4019 = vmatmul.msk.f32.gmra.mxu2 %vm317_vm0, %v1351_v4 }
  0xad   : > { %4056 = vmatmul.msk.f32.gmra.mxu3 %vm317_vm0, %v1353_v18  ;;  %4092 = vmatmul.msk.f32.gmra.mxu0 %vm317_vm0, %v1731_v19 }
  0xaf   : > { %v4691_v20 = vpop.f32.mrf.mxu2 }
  0xb0   : > { %v4693_v21 = vpop.f32.mrf.mxu3 }
  0xb1   : > { %v4695_v22 = vpop.f32.mrf.mxu1 }
  0xb2   : > { %v4698_v24 = vpop.f32.mrf.mxu0 }
  0xb4   : > { %3988 = vmatmul.msk.f32.gmra.mxu1 %vm317_vm0, %v601_v23  ;;  %4020 = vmatmul.msk.f32.gmra.mxu2 %vm317_vm0, %v1352_v11  ;;  %v1361_v23 = vld [vmem:[%s4512_s17 + $0x92] sm:$0xff] }
  0xb5   : > { %4057 = vmatmul.msk.f32.gmra.mxu3 %vm317_vm0, %v1354_v25  ;;  %4093 = vmatmul.msk.f32.gmra.mxu0 %vm317_vm0, %v1732_v26 }
  0xb7   : > { %v4706_v27 = vpop.f32.mrf.mxu2 }
  0xb8   : > { %v4708_v28 = vpop.f32.mrf.mxu3 }
  0xb9   : > { %v4710_v29 = vpop.f32.mrf.mxu1 }
  0xba   : > { %v4713_v31 = vpop.f32.mrf.mxu0 }
  0xbc   : > { %3989 = vmatmul.msk.f32.gmra.mxu1 %vm317_vm0, %v602_v30  ;;  %4021 = vmatmul.msk.f32.gmra.mxu2 %vm317_vm0, %v1353_v18  ;;  %v608_v18 = vld [vmem:[%s4512_s17 + $0xa9] sm:$0xff] }
  0xbd   : > { %4058 = vmatmul.msk.f32.gmra.mxu3 %vm317_vm0, %v1355_v32  ;;  %4094 = vmatmul.msk.f32.gmra.mxu0 %vm317_vm0, %v1733_v33 }
  0xbf   : > { %v4721_v34 = vpop.f32.mrf.mxu2 }
  0xc0   : > { %v4723_v35 = vpop.f32.mrf.mxu3 }
  0xc1   : > { %v4725_v36 = vpop.f32.mrf.mxu1 }
  0xc2   : > { %v4728_v38 = vpop.f32.mrf.mxu0  ;;  %v894_v26 = vadd.f32 %v4725_v36, %v4653_v3 }
  0xc4   : > { %3990 = vmatmul.msk.f32.gmra.mxu1 %vm317_vm0, %v603_v37  ;;  %4022 = vmatmul.msk.f32.gmra.mxu2 %vm317_vm0, %v1354_v25  ;;  %v1739_v25 = vld [vmem:[%s4512_s17 + $0x8b] sm:$0xff] }
  0xc5   : > { %4059 = vmatmul.msk.f32.gmra.mxu3 %vm317_vm0, %v1356_v39  ;;  %4095 = vmatmul.msk.f32.gmra.mxu0 %vm317_vm0, %v1734_v40 }
  0xc7   : > { %v4736_v41 = vpop.f32.mrf.mxu2 }
  0xc8   : > { %v4738_v42 = vpop.f32.mrf.mxu3 }
  0xc9   : > { %v4740_v43 = vpop.f32.mrf.mxu1 }
  0xca   : > { %v4743_v45 = vpop.f32.mrf.mxu0  ;;  %v895_v3 = vadd.f32 %v4740_v43, %v4668_v10 }
  0xcc   : > { %3991 = vmatmul.msk.f32.gmra.mxu1 %vm317_vm0, %v604_v44  ;;  %4023 = vmatmul.msk.f32.gmra.mxu2 %vm317_vm0, %v1355_v32 }
  0xcd   : > { %4060 = vmatmul.msk.f32.gmra.mxu3 %vm317_vm0, %v1357_v46  ;;  %4096 = vmatmul.msk.f32.gmra.mxu0 %vm317_vm0, %v1735_v47  ;;  %v1740_v47 = vld [vmem:[%s4512_s17 + $0x93] sm:$0xff] }
  0xcf   : > { %v4751_v48 = vpop.f32.mrf.mxu2 }
  0xd0   : > { %v4753_v49 = vpop.f32.mrf.mxu3 }
  0xd1   : > { %v4755_v50 = vpop.f32.mrf.mxu1 }
  0xd2   : > { %v4758_v52 = vpop.f32.mrf.mxu0  ;;  %v896_v10 = vadd.f32 %v4755_v50, %v4683_v17 }
  0xd4   : > { %3992 = vmatmul.msk.f32.gmra.mxu1 %vm317_vm0, %v605_v51  ;;  %4024 = vmatmul.msk.f32.gmra.mxu2 %vm317_vm0, %v1356_v39  ;;  %v609_v39 = vld [vmem:[%s4512_s17 + $0xb1] sm:$0xff] }
  0xd5   : > { %4061 = vmatmul.msk.f32.gmra.mxu3 %vm317_vm0, %v1358_v53  ;;  %4097 = vmatmul.msk.f32.gmra.mxu0 %vm317_vm0, %v1736_v54 }
  0xd7   : > { %v4766_v55 = vpop.f32.mrf.mxu2 }
  0xd8   : > { %v4768_v56 = vpop.f32.mrf.mxu3 }
  0xd9   : > { %v4770_v57 = vpop.f32.mrf.mxu1 }
  0xda   : > { %v4773_v59 = vpop.f32.mrf.mxu0  ;;  %v897_v17 = vadd.f32 %v4770_v57, %v4698_v24 }
  0xdc   : > { %3993 = vmatmul.msk.f32.gmra.mxu1 %vm317_vm0, %v606_v58  ;;  %4025 = vmatmul.msk.f32.gmra.mxu2 %vm317_vm0, %v1357_v46  ;;  %v1362_v46 = vld [vmem:[%s4512_s17 + $0x9a] sm:$0xff] }
  0xdd   : > { %4062 = vmatmul.msk.f32.gmra.mxu3 %vm317_vm0, %v1359_v60  ;;  %4098 = vmatmul.msk.f32.gmra.mxu0 %vm317_vm0, %v1737_v61  ;;  %v610_v58 = vld [vmem:[%s4512_s17 + $0xb9] sm:$0xff] }
  0xdf   : > { %v4781_v62 = vpop.f32.mrf.mxu2 }
  0xe0   : > { %v4783_v63 = vpop.f32.mrf.mxu3 }
  0xe1   : > { %v4785_v0 = vpop.f32.mrf.mxu1 }
  0xe2   : > { %v4788_v4 = vpop.f32.mrf.mxu0  ;;  %v898_v24 = vadd.f32 %v4785_v0, %v4713_v31 }
  0xe4   : > { %3994 = vmatmul.msk.f32.gmra.mxu1 %vm317_vm0, %v607_v2  ;;  %4026 = vmatmul.msk.f32.gmra.mxu2 %vm317_vm0, %v1358_v53  ;;  %v1363_v2 = vld [vmem:[%s4512_s17 + $0xa2] sm:$0xff] }
  0xe5   : > { %4063 = vmatmul.msk.f32.gmra.mxu3 %vm317_vm0, %v1360_v5  ;;  %4099 = vmatmul.msk.f32.gmra.mxu0 %vm317_vm0, %v1738_v9 }
  0xe7   : > { %v4796_v11 = vpop.f32.mrf.mxu2 }
  0xe8   : > { %v4798_v12 = vpop.f32.mrf.mxu3 }
  0xe9   : > { %v4800_v16 = vpop.f32.mrf.mxu1 }
  0xea   : > { %v4803_v19 = vpop.f32.mrf.mxu0  ;;  %v899_v31 = vadd.f32 %v4800_v16, %v4728_v38 }
  0xec   : > { %3995 = vmatmul.msk.f32.gmra.mxu1 %vm317_vm0, %v608_v18  ;;  %4027 = vmatmul.msk.f32.gmra.mxu2 %vm317_vm0, %v1359_v60 }
  0xed   : > { %4064 = vmatmul.msk.f32.gmra.mxu3 %vm317_vm0, %v1361_v23  ;;  %4100 = vmatmul.msk.f32.gmra.mxu0 %vm317_vm0, %v1739_v25 }
  0xef   : > { %v1129_v30 = vpop.f32.mrf.mxu2 }
  0xf0   : > { %v1273_v32 = vadd.f32 %v1129_v30, %v894_v26  ;;  %v1508_v33 = vpop.f32.mrf.mxu3  ;;  %v611_v26 = vld [vmem:[%s4512_s17 + $0xc1] sm:$0xff] }
  0xf1   : > { %v4813_v37 = vpop.f32.mrf.mxu1 }
  0xf2   : > { %v4816_v40 = vadd.f32 %v1508_v33, %v1273_v32  ;;  %v4818_v44 = vpop.f32.mrf.mxu0  ;;  %v1742_v33 = vld [vmem:[%s4512_s17 + $0xa3] sm:$0xff]  ;;  %v900_v38 = vadd.f32 %v4813_v37, %v4743_v45 }
  0xf4   : > { %3996 = vmatmul.msk.f32.gmra.mxu1 %vm317_vm0, %v609_v39  ;;  %4028 = vmatmul.msk.f32.gmra.mxu2 %vm317_vm0, %v1360_v5  ;;  %v1741_v5 = vld [vmem:[%s4512_s17 + $0x9b] sm:$0xff] }
  0xf5   : > { %4065 = vmatmul.msk.f32.gmra.mxu3 %vm317_vm0, %v1362_v46  ;;  %4101 = vmatmul.msk.f32.gmra.mxu0 %vm317_vm0, %v1740_v47 }
  0xf7   : > { %v1132_v36 = vpop.f32.mrf.mxu2 }
  0xf8   : > { %v1274_v51 = vadd.f32 %v1132_v36, %v895_v3  ;;  %v1511_v53 = vpop.f32.mrf.mxu3  ;;  %v612_v36 = vld [vmem:[%s4512_s17 + $0xc9] sm:$0xff] }
  0xf9   : > { %v4828_v54 = vpop.f32.mrf.mxu1 }
  0xfa   : > { %v4831_v60 = vadd.f32 %v1511_v53, %v1274_v51  ;;  %v4833_v61 = vpop.f32.mrf.mxu0  ;;  %v901_v45 = vadd.f32 %v4828_v54, %v4758_v52 }
  0xfc   : > { %3997 = vmatmul.msk.f32.gmra.mxu1 %vm317_vm0, %v610_v58  ;;  %4029 = vmatmul.msk.f32.gmra.mxu2 %vm317_vm0, %v1361_v23  ;;  %v1364_v23 = vld [vmem:[%s4512_s17 + $0xaa] sm:$0xff] }
  0xfd   : > { %4066 = vmatmul.msk.f32.gmra.mxu3 %vm317_vm0, %v1363_v2  ;;  %4102 = vmatmul.msk.f32.gmra.mxu0 %vm317_vm0, %v1741_v5  ;;  %v1743_v58 = vld [vmem:[%s4512_s17 + $0xab] sm:$0xff] }
  0xff   : > { %v1135_v43 = vpop.f32.mrf.mxu2 }
 0x100   : > { %v1275_v9 = vadd.f32 %v1135_v43, %v896_v10  ;;  %v1514_v18 = vpop.f32.mrf.mxu3 }
 0x101   : > { %v4843_v25 = vpop.f32.mrf.mxu1 }
 0x102   : > { %v4846_v30 = vadd.f32 %v1514_v18, %v1275_v9  ;;  %v4848_v32 = vpop.f32.mrf.mxu0  ;;  %v613_v9 = vld [vmem:[%s4512_s17 + $0xd1] sm:$0xff]  ;;  %v902_v52 = vadd.f32 %v4843_v25, %v4773_v59 }
 0x104   : > { %3998 = vmatmul.msk.f32.gmra.mxu1 %vm317_vm0, %v611_v26  ;;  %4030 = vmatmul.msk.f32.gmra.mxu2 %vm317_vm0, %v1362_v46  ;;  %v1365_v46 = vld [vmem:[%s4512_s17 + $0xb2] sm:$0xff] }
 0x105   : > { %4067 = vmatmul.msk.f32.gmra.mxu3 %vm317_vm0, %v1364_v23  ;;  %4103 = vmatmul.msk.f32.gmra.mxu0 %vm317_vm0, %v1742_v33  ;;  %v1744_v33 = vld [vmem:[%s4512_s17 + $0xb3] sm:$0xff] }
 0x107   : > { %v1138_v50 = vpop.f32.mrf.mxu2 }
 0x108   : > { %v1276_v39 = vadd.f32 %v1138_v50, %v897_v17  ;;  %v1517_v47 = vpop.f32.mrf.mxu3 }
 0x109   : > { %v4858_v3 = vpop.f32.mrf.mxu1 }
 0x10a   : > { %v4861_v51 = vadd.f32 %v1517_v47, %v1276_v39  ;;  %v4863_v53 = vpop.f32.mrf.mxu0  ;;  %v614_v47 = vld [vmem:[%s4512_s17 + $0xd9] sm:$0xff]  ;;  %v903_v59 = vadd.f32 %v4858_v3, %v4788_v4 }
 0x10c   : > { %3999 = vmatmul.msk.f32.gmra.mxu1 %vm317_vm0, %v612_v36  ;;  %4031 = vmatmul.msk.f32.gmra.mxu2 %vm317_vm0, %v1363_v2  ;;  %v1366_v2 = vld [vmem:[%s4512_s17 + $0xba] sm:$0xff] }
 0x10d   : > { %4068 = vmatmul.msk.f32.gmra.mxu3 %vm317_vm0, %v1365_v46  ;;  %4104 = vmatmul.msk.f32.gmra.mxu0 %vm317_vm0, %v1743_v58 }
 0x10f   : > { %v1141_v57 = vpop.f32.mrf.mxu2 }
 0x110   : > { %v1277_v5 = vadd.f32 %v1141_v57, %v898_v24  ;;  %v1520_v10 = vpop.f32.mrf.mxu3  ;;  %v1745_v24 = vld [vmem:[%s4512_s17 + $0xbb] sm:$0xff] }
 0x111   : > { %v4873_v43 = vpop.f32.mrf.mxu1 }
 0x112   : > { %v4876_v18 = vadd.f32 %v1520_v10, %v1277_v5  ;;  %v4878_v26 = vpop.f32.mrf.mxu0  ;;  %v904_v4 = vadd.f32 %v4873_v43, %v4803_v19 }
 0x114   : > { %4000 = vmatmul.msk.f32.gmra.mxu1 %vm317_vm0, %v613_v9  ;;  %4032 = vmatmul.msk.f32.gmra.mxu2 %vm317_vm0, %v1364_v23  ;;  %v1367_v23 = vld [vmem:[%s4512_s17 + $0xc2] sm:$0xff] }
 0x115   : > { %4069 = vmatmul.msk.f32.gmra.mxu3 %vm317_vm0, %v1366_v2  ;;  %4105 = vmatmul.msk.f32.gmra.mxu0 %vm317_vm0, %v1744_v33  ;;  %v615_v9 = vld [vmem:[%s4512_s17 + $0xe1] sm:$0xff] }
 0x117   : > { %v1144_v0 = vpop.f32.mrf.mxu2 }
 0x118   : > { %v1278_v17 = vadd.f32 %v1144_v0, %v899_v31  ;;  %v1523_v50 = vpop.f32.mrf.mxu3  ;;  %v1746_v0 = vld [vmem:[%s4512_s17 + $0xc3] sm:$0xff] }
 0x119   : > { %v4888_v39 = vpop.f32.mrf.mxu1 }
 0x11a   : > { %v4891_v36 = vadd.f32 %v1523_v50, %v1278_v17  ;;  %v4893_v58 = vpop.f32.mrf.mxu0  ;;  %v905_v19 = vadd.f32 %v4888_v39, %v4650_v1 }
 0x11c   : > { %4001 = vmatmul.msk.f32.gmra.mxu1 %vm317_vm0, %v614_v47  ;;  %4033 = vmatmul.msk.f32.gmra.mxu2 %vm317_vm0, %v1365_v46  ;;  %v1368_v46 = vld [vmem:[%s4512_s17 + $0xca] sm:$0xff] }
 0x11d   : > { %4070 = vmatmul.msk.f32.gmra.mxu3 %vm317_vm0, %v1367_v23  ;;  %4106 = vmatmul.msk.f32.gmra.mxu0 %vm317_vm0, %v1745_v24  ;;  %v616_v24 = vld [vmem:[%s4512_s17 + $0xe9] sm:$0xff] }
 0x11f   : > { %v1147_v16 = vpop.f32.mrf.mxu2 }
 0x120   : > { %v1279_v57 = vadd.f32 %v1147_v16, %v900_v38  ;;  %v1526_v5 = vpop.f32.mrf.mxu3 }
 0x121   : > { %v4903_v10 = vpop.f32.mrf.mxu1 }
 0x122   : > { %v4906_v33 = vadd.f32 %v1526_v5, %v1279_v57  ;;  %v4908_v31 = vpop.f32.mrf.mxu0  ;;  %v1747_v57 = vld [vmem:[%s4512_s17 + $0xcb] sm:$0xff]  ;;  %v906_v1 = vadd.f32 %v4903_v10, %v4665_v8 }
 0x124   : > { %4002 = vmatmul.msk.f32.gmra.mxu1 %vm317_vm0, %v615_v9  ;;  %4034 = vmatmul.msk.f32.gmra.mxu2 %vm317_vm0, %v1366_v2  ;;  %v1369_v2 = vld [vmem:[%s4512_s17 + $0xd2] sm:$0xff] }
 0x125   : > { %4071 = vmatmul.msk.f32.gmra.mxu3 %vm317_vm0, %v1368_v46  ;;  %4107 = vmatmul.msk.f32.gmra.mxu0 %vm317_vm0, %v1746_v0 }
 0x127   : > { %v1150_v37 = vpop.f32.mrf.mxu2 }
 0x128   : > { %v1280_v17 = vadd.f32 %v1150_v37, %v901_v45  ;;  %v1529_v50 = vpop.f32.mrf.mxu3  ;;  %v617_v45 = vld [vmem:[%s4512_s17 + $0xf1] sm:$0xff] }
 0x129   : > { %v4918_v47 = vpop.f32.mrf.mxu1 }
 0x12a   : > { %v4921_v38 = vadd.f32 %v1529_v50, %v1280_v17  ;;  %v4923_v16 = vpop.f32.mrf.mxu0  ;;  %v1748_v50 = vld [vmem:[%s4512_s17 + $0xd3] sm:$0xff]  ;;  %v907_v8 = vadd.f32 %v4918_v47, %v4680_v15 }
 0x12c   : > { %4003 = vmatmul.msk.f32.gmra.mxu1 %vm317_vm0, %v616_v24  ;;  %4035 = vmatmul.msk.f32.gmra.mxu2 %vm317_vm0, %v1367_v23  ;;  %v1370_v23 = vld [vmem:[%s4512_s17 + $0xda] sm:$0xff] }
 0x12d   : > { %4072 = vmatmul.msk.f32.gmra.mxu3 %vm317_vm0, %v1369_v2  ;;  %4108 = vmatmul.msk.f32.gmra.mxu0 %vm317_vm0, %v1747_v57 }
 0x12f   : > { %v1153_v54 = vpop.f32.mrf.mxu2 }
 0x130   : > { %v1281_v5 = vadd.f32 %v1153_v54, %v902_v52  ;;  %v1532_v9 = vpop.f32.mrf.mxu3  ;;  %v618_v54 = vld [vmem:[%s4512_s17 + $0xf9] sm:$0xff] }
 0x131   : > { %v4933_v0 = vpop.f32.mrf.mxu1 }
 0x132   : > { %v4936_v37 = vadd.f32 %v1532_v9, %v1281_v5  ;;  %v4938_v17 = vpop.f32.mrf.mxu0  ;;  %v908_v15 = vadd.f32 %v4933_v0, %v4695_v22  ;;  %v4158_v22 = vld [vmem:[%s5901_s2 + $0x30] sm:$0xff] }
 0x133   : > { %2643 = vmatpush.msra.mxu2 %v4158_v22 }
 0x134   : > { %4004 = vmatmul.msk.f32.gmra.mxu1 %vm317_vm0, %v617_v45  ;;  %4036 = vmatmul.msk.f32.gmra.mxu2 %vm317_vm0, %v1368_v46  ;;  %v1371_v46 = vld [vmem:[%s4512_s17 + $0xe2] sm:$0xff] }
 0x135   : > { %4073 = vmatmul.msk.f32.gmra.mxu3 %vm317_vm0, %v1370_v23  ;;  %4109 = vmatmul.msk.f32.gmra.mxu0 %vm317_vm0, %v1748_v50  ;;  %v1749_v45 = vld [vmem:[%s4512_s17 + $0xdb] sm:$0xff] }
 0x137   : > { %v1156_v25 = vpop.f32.mrf.mxu2 }
 0x138   : > { %v1282_v24 = vadd.f32 %v1156_v25, %v903_v59  ;;  %v1535_v57 = vpop.f32.mrf.mxu3 }
 0x139   : > { %v4948_v52 = vpop.f32.mrf.mxu1 }
 0x13a   : > { %v4951_v5 = vadd.f32 %v1535_v57, %v1282_v24  ;;  %v4953_v9 = vpop.f32.mrf.mxu0  ;;  %v619_v24 = vld [vmem:[%s4512_s17 + $0x101] sm:$0xff]  ;;  %v909_v0 = vadd.f32 %v4948_v52, %v4710_v29  ;;  %v1755_v29 = vld [vmem:[%s4512_s17 + $0x10b] sm:$0xff] }
 0x13b   : > { %5909 = vst [vmem:[#allocation8_spill] sm:$0xff] %v4953_v9 }
 0x13c   : > { %5908 = vst [vmem:[#allocation7_spill] sm:$0xff] %v4951_v5  ;;  %4005 = vmatmul.msk.f32.gmra.mxu1 %vm317_vm0, %v618_v54  ;;  %4037 = vmatmul.msk.f32.gmra.mxu2 %vm317_vm0, %v1369_v2  ;;  %v1372_v54 = vld [vmem:[%s4512_s17 + $0xea] sm:$0xff] }
 0x13d   : > { %4074 = vmatmul.msk.f32.gmra.mxu3 %vm317_vm0, %v1371_v46  ;;  %4110 = vmatmul.msk.f32.gmra.mxu0 %vm317_vm0, %v1749_v45  ;;  %v1750_v2 = vld [vmem:[%s4512_s17 + $0xe3] sm:$0xff] }
 0x13e   : > { %v4121_v45 = vld [vmem:[%s5901_s2 + $0x28] sm:$0xff] }
 0x13f   : > { %v1159_v3 = vpop.f32.mrf.mxu2  ;;  %2264 = vmatpush.msra.mxu1 %v4121_v45  ;;  %v1751_v45 = vld [vmem:[%s4512_s17 + $0xeb] sm:$0xff] }
 0x140   : > { %v1283_v50 = vadd.f32 %v1159_v3, %v904_v4  ;;  %v1538_v59 = vpop.f32.mrf.mxu3 }
 0x141   : > { %v4963_v25 = vpop.f32.mrf.mxu1 }
 0x142   : > { %v4966_v57 = vadd.f32 %v1538_v59, %v1283_v50  ;;  %v4968_v9 = vpop.f32.mrf.mxu0  ;;  %v620_v59 = vld [vmem:[%s4512_s17 + $0x109] sm:$0xff]  ;;  %v910_v52 = vadd.f32 %v4963_v25, %v4661_v6  ;;  %v1756_v6 = vld [vmem:[%s4512_s17 + $0x113] sm:$0xff] }
 0x143   : > { %5911 = vst [vmem:[#allocation10_spill] sm:$0xff] %v4968_v9  ;;  %v1752_v9 = vld [vmem:[%s4512_s17 + $0xf3] sm:$0xff] }
 0x144   : > { %5910 = vst [vmem:[#allocation9_spill] sm:$0xff] %v4966_v57  ;;  %4006 = vmatmul.msk.f32.gmra.mxu1 %vm317_vm0, %v619_v24  ;;  %4038 = vmatmul.msk.f32.gmra.mxu2 %vm317_vm0, %v1370_v23  ;;  %v1373_v23 = vld [vmem:[%s4512_s17 + $0xf2] sm:$0xff]  ;;  %v1753_v57 = vld [vmem:[%s4512_s17 + $0xfb] sm:$0xff] }
 0x145   : > { %4075 = vmatmul.msk.f32.gmra.mxu3 %vm317_vm0, %v1372_v54  ;;  %4111 = vmatmul.msk.f32.gmra.mxu0 %vm317_vm0, %v1750_v2 }
 0x147   : > { %v1162_v43 = vpop.f32.mrf.mxu2 }
 0x148   : > { %v1284_v4 = vadd.f32 %v1162_v43, %v905_v19  ;;  %v1541_v3 = vpop.f32.mrf.mxu3 }
 0x149   : > { %v4981_v50 = vpop.f32.mrf.mxu1 }
 0x14a   : > { %v4984_v5 = vadd.f32 %v1541_v3, %v1284_v4  ;;  %v4986_v24 = vpop.f32.mrf.mxu0  ;;  %v621_v4 = vld [vmem:[%s4512_s17 + $0x111] sm:$0xff]  ;;  %v911_v25 = vadd.f32 %v4981_v50, %v4676_v13 }
 0x14b   : > { %5913 = vst [vmem:[#allocation12_spill] sm:$0xff] %v4986_v24 }
 0x14c   : > { %5912 = vst [vmem:[#allocation11_spill] sm:$0xff] %v4984_v5  ;;  %4007 = vmatmul.msk.f32.gmra.mxu1 %vm317_vm0, %v620_v59  ;;  %4039 = vmatmul.msk.f32.gmra.mxu2 %vm317_vm0, %v1371_v46  ;;  %v1374_v46 = vld [vmem:[%s4512_s17 + $0xfa] sm:$0xff] }
 0x14d   : > { %4076 = vmatmul.msk.f32.gmra.mxu3 %vm317_vm0, %v1373_v23  ;;  %4112 = vmatmul.msk.f32.gmra.mxu0 %vm317_vm0, %v1751_v45 }
 0x14f   : > { %v1165_v39 = vpop.f32.mrf.mxu2 }
 0x150   : > { %v1285_v2 = vadd.f32 %v1165_v39, %v906_v1  ;;  %v1544_v19 = vpop.f32.mrf.mxu3 }
 0x151   : > { %v4996_v43 = vpop.f32.mrf.mxu1 }
 0x152   : > { %v4999_v3 = vadd.f32 %v1544_v19, %v1285_v2  ;;  %v5001_v59 = vpop.f32.mrf.mxu0  ;;  %v622_v2 = vld [vmem:[%s4512_s17 + $0x119] sm:$0xff]  ;;  %v912_v13 = vadd.f32 %v4996_v43, %v4691_v20 }
 0x153   : > { %5915 = vst [vmem:[#allocation14_spill] sm:$0xff] %v5001_v59  ;;  %v1757_v59 = vld [vmem:[%s4512_s17 + $0x11b] sm:$0xff] }
 0x154   : > { %5914 = vst [vmem:[#allocation13_spill] sm:$0xff] %v4999_v3  ;;  %4008 = vmatmul.msk.f32.gmra.mxu1 %vm317_vm0, %v621_v4  ;;  %4040 = vmatmul.msk.f32.gmra.mxu2 %vm317_vm0, %v1372_v54  ;;  %v1375_v54 = vld [vmem:[%s4512_s17 + $0x102] sm:$0xff]  ;;  %v1380_v3 = vld [vmem:[%s4512_s17 + $0x12a] sm:$0xff] }
 0x155   : > { %4077 = vmatmul.msk.f32.gmra.mxu3 %vm317_vm0, %v1374_v46  ;;  %4113 = vmatmul.msk.f32.gmra.mxu0 %vm317_vm0, %v1752_v9 }
 0x157   : > { %v1168_v10 = vpop.f32.mrf.mxu2 }
 0x158   : > { %v1286_v45 = vadd.f32 %v1168_v10, %v907_v8  ;;  %v1547_v1 = vpop.f32.mrf.mxu3 }
 0x159   : > { %v5011_v39 = vpop.f32.mrf.mxu1 }
 0x15a   : > { %v5014_v19 = vadd.f32 %v1547_v1, %v1286_v45  ;;  %v5016_v4 = vpop.f32.mrf.mxu0  ;;  %v2103_v45 = vld [vmem:[%s4512_s17 + $0x14] sm:$0xff]  ;;  %v913_v20 = vadd.f32 %v5011_v39, %v4706_v27 }
 0x15b   : > { %5917 = vst [vmem:[#allocation16_spill] sm:$0xff] %v5016_v4  ;;  %v1759_v4 = vld [vmem:[%s4512_s17 + $0x12b] sm:$0xff] }
 0x15c   : > { %5916 = vst [vmem:[#allocation15_spill] sm:$0xff] %v5014_v19  ;;  %4009 = vmatmul.msk.f32.gmra.mxu1 %vm317_vm0, %v622_v2  ;;  %4041 = vmatmul.msk.f32.gmra.mxu2 %vm317_vm0, %v1373_v23  ;;  %v1376_v2 = vld [vmem:[%s4512_s17 + $0x10a] sm:$0xff] }
 0x15d   : > { %4078 = vmatmul.msk.f32.gmra.mxu3 %vm317_vm0, %v1375_v54  ;;  %4114 = vmatmul.msk.f32.gmra.mxu0 %vm317_vm0, %v1753_v57  ;;  %v1754_v23 = vld [vmem:[%s4512_s17 + $0x103] sm:$0xff] }
 0x15f   : > { %v1171_v47 = vpop.f32.mrf.mxu2 }
 0x160   : > { %v1287_v9 = vadd.f32 %v1171_v47, %v908_v15  ;;  %v1550_v8 = vpop.f32.mrf.mxu3 }
 0x161   : > { %v5026_v10 = vpop.f32.mrf.mxu1 }
 0x162   : > { %v5029_v1 = vadd.f32 %v1550_v8, %v1287_v9  ;;  %v5031_v24 = vpop.f32.mrf.mxu0  ;;  %v2104_v8 = vld [vmem:[%s4512_s17 + $0x1c] sm:$0xff]  ;;  %v914_v27 = vadd.f32 %v5026_v10, %v4721_v34 }
 0x164   : > { %4042 = vmatmul.msk.f32.gmra.mxu2 %vm317_vm0, %v1374_v46  ;;  %4122 = vmatmul.msk.f32.vlgmr.msra.gmra.mxu1 %vm317_vm0, %v2103_v45  ;;  %v4195_v46 = vld [vmem:[%s5901_s2 + $0x38] sm:$0xff] }
 0x165   : > { %4079 = vmatmul.msk.f32.gmra.mxu3 %vm317_vm0, %v1376_v2  ;;  %4115 = vmatmul.msk.f32.gmra.mxu0 %vm317_vm0, %v1754_v23  ;;  %v1377_v23 = vld [vmem:[%s4512_s17 + $0x112] sm:$0xff] }
 0x166   : > { %3022 = vmatpush.msra.mxu3 %v4195_v46 }
 0x167   : > { %v1174_v57 = vpop.f32.mrf.mxu2 }
 0x168   : > { %v1288_v15 = vadd.f32 %v1174_v57, %v909_v0  ;;  %v1553_v47 = vpop.f32.mrf.mxu3 }
 0x169   : > { %v5047_v9 = vpop.f32.mrf.mxu1 }
 0x16a   : > { %v5050_v45 = vadd.f32 %v1553_v47, %v1288_v15  ;;  %v5052_v5 = vpop.f32.mrf.mxu0  ;;  %v4232_v15 = vld [vmem:[%s5901_s2 + $0x40] sm:$0xff]  ;;  %v915_v34 = vadd.f32 %v5047_v9, %v4736_v41 }
 0x16b   : > { %5919 = vst [vmem:[#allocation18_spill] sm:$0xff] %v5052_v5  ;;  %3401 = vmatpush.msra.mxu0 %v4232_v15  ;;  %v2106_v15 = vld [vmem:[%s4512_s17 + $0x2c] sm:$0xff] }
 0x16c   : > { %5918 = vst [vmem:[#allocation17_spill] sm:$0xff] %v5050_v45  ;;  %4043 = vmatmul.msk.f32.gmra.mxu2 %vm317_vm0, %v1375_v54  ;;  %4123 = vmatmul.msk.f32.gmra.mxu1 %vm317_vm0, %v2104_v8  ;;  %v2105_v54 = vld [vmem:[%s4512_s17 + $0x24] sm:$0xff] }
 0x16d   : > { %4080 = vmatmul.msk.f32.gmra.mxu3 %vm317_vm0, %v1377_v23  ;;  %4116 = vmatmul.msk.f32.gmra.mxu0 %vm317_vm0, %v1755_v29  ;;  %v1378_v29 = vld [vmem:[%s4512_s17 + $0x11a] sm:$0xff]  ;;  %v1379_v45 = vld [vmem:[%s4512_s17 + $0x122] sm:$0xff] }
 0x16f   : > { %v1177_v22 = vpop.f32.mrf.mxu2 }
 0x170   : > { %v1289_v0 = vadd.f32 %v1177_v22, %v910_v52  ;;  %v1556_v57 = vpop.f32.mrf.mxu3 }
 0x171   : > { %v5065_v47 = vpop.f32.mrf.mxu1 }
 0x172   : > { %v5068_v46 = vadd.f32 %v1556_v57, %v1289_v0  ;;  %v5070_v8 = vpop.f32.mrf.mxu0  ;;  %v916_v41 = vadd.f32 %v5065_v47, %v4751_v48 }
 0x174   : > { %4044 = vmatmul.msk.f32.gmra.mxu2 %vm317_vm0, %v1376_v2  ;;  %4124 = vmatmul.msk.f32.gmra.mxu1 %vm317_vm0, %v2105_v54 }
 0x175   : > { %4081 = vmatmul.msk.f32.gmra.mxu3 %vm317_vm0, %v1378_v29  ;;  %4117 = vmatmul.msk.f32.gmra.mxu0 %vm317_vm0, %v1756_v6 }
 0x177   : > { %v1180_v52 = vpop.f32.mrf.mxu2 }
 0x178   : > { %v1290_v22 = vadd.f32 %v1180_v52, %v911_v25  ;;  %v1559_v0 = vpop.f32.mrf.mxu3 }
 0x179   : > { %v5080_v57 = vpop.f32.mrf.mxu1 }
 0x17a   : > { %v5083_v5 = vadd.f32 %v1559_v0, %v1290_v22  ;;  %v5085_v2 = vpop.f32.mrf.mxu0  ;;  %v2107_v22 = vld [vmem:[%s4512_s17 + $0x34] sm:$0xff]  ;;  %v917_v48 = vadd.f32 %v5080_v57, %v4766_v55 }
 0x17c   : > { %4045 = vmatmul.msk.f32.gmra.mxu2 %vm317_vm0, %v1377_v23  ;;  %4125 = vmatmul.msk.f32.gmra.mxu1 %vm317_vm0, %v2106_v15 }
 0x17d   : > { %4082 = vmatmul.msk.f32.gmra.mxu3 %vm317_vm0, %v1379_v45  ;;  %4118 = vmatmul.msk.f32.gmra.mxu0 %vm317_vm0, %v1757_v59  ;;  %v1758_v45 = vld [vmem:[%s4512_s17 + $0x123] sm:$0xff] }
 0x17f   : > { %v1183_v50 = vpop.f32.mrf.mxu2 }
 0x180   : > { %v1291_v6 = vadd.f32 %v1183_v50, %v912_v13  ;;  %v1562_v25 = vpop.f32.mrf.mxu3 }
 0x181   : > { %v5095_v52 = vpop.f32.mrf.mxu1 }
 0x182   : > { %v5098_v0 = vadd.f32 %v1562_v25, %v1291_v6  ;;  %v5100_v23 = vpop.f32.mrf.mxu0  ;;  %v2108_v6 = vld [vmem:[%s4512_s17 + $0x3c] sm:$0xff]  ;;  %v918_v55 = vadd.f32 %v5095_v52, %v4781_v62 }
 0x184   : > { %4046 = vmatmul.msk.f32.gmra.mxu2 %vm317_vm0, %v1378_v29  ;;  %4126 = vmatmul.msk.f32.gmra.mxu1 %vm317_vm0, %v2107_v22 }
 0x185   : > { %4083 = vmatmul.msk.f32.gmra.mxu3 %vm317_vm0, %v1380_v3  ;;  %4119 = vmatmul.msk.f32.gmra.mxu0 %vm317_vm0, %v1758_v45  ;;  %v2861_v3 = vld [vmem:[%s4512_s17 + $0x25] sm:$0xff] }
 0x187   : > { %v1186_v43 = vpop.f32.mrf.mxu2 }
 0x188   : > { %v1292_v59 = vadd.f32 %v1186_v43, %v913_v20  ;;  %v1565_v13 = vpop.f32.mrf.mxu3 }
 0x189   : > { %v5110_v50 = vpop.f32.mrf.mxu1 }
 0x18a   : > { %v5113_v25 = vadd.f32 %v1565_v13, %v1292_v59  ;;  %v5115_v29 = vpop.f32.mrf.mxu0  ;;  %v2109_v59 = vld [vmem:[%s4512_s17 + $0x44] sm:$0xff]  ;;  %v919_v62 = vadd.f32 %v5110_v50, %v4796_v11 }
 0x18c   : > { %4127 = vmatmul.msk.f32.gmra.mxu1 %vm317_vm0, %v2108_v6  ;;  %4159 = vmatmul.msk.f32.vlgmr.msra.gmra.mxu2 %vm317_vm0, %v2105_v54  ;;  %v2862_v54 = vld [vmem:[%s4512_s17 + $0x2d] sm:$0xff] }
 0x18d   : > { %4120 = vmatmul.msk.f32.gmra.mxu0 %vm317_vm0, %v1759_v4  ;;  %4196 = vmatmul.msk.f32.vlgmr.msra.gmra.mxu3 %vm317_vm0, %v2861_v3  ;;  %v3240_v4 = vld [vmem:[%s4512_s17 + $0x26] sm:$0xff] }
 0x18f   : > { %v1189_v39 = vpop.f32.mrf.mxu2 }
 0x190   : > { %v1293_v45 = vadd.f32 %v1189_v39, %v914_v27  ;;  %v1568_v20 = vpop.f32.mrf.mxu3 }
 0x191   : > { %v5125_v43 = vpop.f32.mrf.mxu1 }
 0x192   : > { %v5128_v13 = vadd.f32 %v1568_v20, %v1293_v45  ;;  %v5130_v19 = vpop.f32.mrf.mxu0  ;;  %v2110_v45 = vld [vmem:[%s4512_s17 + $0x4c] sm:$0xff]  ;;  %v920_v11 = vadd.f32 %v5125_v43, %v4663_v7 }
 0x193   : > { %5920 = vst [vmem:[#allocation19_spill] sm:$0xff] %v5130_v19 }
 0x194   : > { %4128 = vmatmul.msk.f32.gmra.mxu1 %vm317_vm0, %v2109_v59  ;;  %4160 = vmatmul.msk.f32.gmra.mxu2 %vm317_vm0, %v2106_v15  ;;  %v2863_v15 = vld [vmem:[%s4512_s17 + $0x35] sm:$0xff] }
 0x195   : > { %4197 = vmatmul.msk.f32.gmra.mxu3 %vm317_vm0, %v2862_v54  ;;  %4233 = vmatmul.msk.f32.vlgmr.msra.gmra.mxu0 %vm317_vm0, %v3240_v4  ;;  %v3241_v54 = vld [vmem:[%s4512_s17 + $0x2e] sm:$0xff] }
 0x197   : > { %v1192_v10 = vpop.f32.mrf.mxu2 }
 0x198   : > { %v1294_v3 = vadd.f32 %v1192_v10, %v915_v34  ;;  %v1571_v27 = vpop.f32.mrf.mxu3 }
 0x199   : > { %v5140_v39 = vpop.f32.mrf.mxu1 }
 0x19a   : > { %v5143_v20 = vadd.f32 %v1571_v27, %v1294_v3  ;;  %v5145_v19 = vpop.f32.mrf.mxu0  ;;  %v2111_v3 = vld [vmem:[%s4512_s17 + $0x54] sm:$0xff]  ;;  %v921_v7 = vadd.f32 %v5140_v39, %v4678_v14 }
 0x19b   : > { %5921 = vst [vmem:[#allocation20_spill] sm:$0xff] %v5145_v19 }
 0x19c   : > { %4129 = vmatmul.msk.f32.gmra.mxu1 %vm317_vm0, %v2110_v45  ;;  %4161 = vmatmul.msk.f32.gmra.mxu2 %vm317_vm0, %v2107_v22  ;;  %v2864_v22 = vld [vmem:[%s4512_s17 + $0x3d] sm:$0xff] }
 0x19d   : > { %4198 = vmatmul.msk.f32.gmra.mxu3 %vm317_vm0, %v2863_v15  ;;  %4234 = vmatmul.msk.f32.gmra.mxu0 %vm317_vm0, %v3241_v54  ;;  %v3242_v15 = vld [vmem:[%s4512_s17 + $0x36] sm:$0xff] }
 0x19f   : > { %v1195_v9 = vpop.f32.mrf.mxu2 }
 0x1a0   : > { %v1295_v4 = vadd.f32 %v1195_v9, %v916_v41  ;;  %v1574_v34 = vpop.f32.mrf.mxu3 }
 0x1a1   : > { %v5155_v10 = vpop.f32.mrf.mxu1 }
 0x1a2   : > { %v5158_v27 = vadd.f32 %v1574_v34, %v1295_v4  ;;  %v5160_v19 = vpop.f32.mrf.mxu0  ;;  %v2112_v4 = vld [vmem:[%s4512_s17 + $0x5c] sm:$0xff]  ;;  %v922_v14 = vadd.f32 %v5155_v10, %v4693_v21 }
 0x1a3   : > { %5922 = vst [vmem:[#allocation21_spill] sm:$0xff] %v5160_v19 }
 0x1a4   : > { %4130 = vmatmul.msk.f32.gmra.mxu1 %vm317_vm0, %v2111_v3  ;;  %4162 = vmatmul.msk.f32.gmra.mxu2 %vm317_vm0, %v2108_v6  ;;  %v2865_v6 = vld [vmem:[%s4512_s17 + $0x45] sm:$0xff] }
 0x1a5   : > { %4199 = vmatmul.msk.f32.gmra.mxu3 %vm317_vm0, %v2864_v22  ;;  %4235 = vmatmul.msk.f32.gmra.mxu0 %vm317_vm0, %v3242_v15  ;;  %v3243_v22 = vld [vmem:[%s4512_s17 + $0x3e] sm:$0xff] }
 0x1a7   : > { %v1198_v47 = vpop.f32.mrf.mxu2 }
 0x1a8   : > { %v1296_v54 = vadd.f32 %v1198_v47, %v917_v48  ;;  %v1577_v41 = vpop.f32.mrf.mxu3 }
 0x1a9   : > { %v5170_v9 = vpop.f32.mrf.mxu1 }
 0x1aa   : > { %v5173_v34 = vadd.f32 %v1577_v41, %v1296_v54  ;;  %v5175_v19 = vpop.f32.mrf.mxu0  ;;  %v2113_v54 = vld [vmem:[%s4512_s17 + $0x64] sm:$0xff]  ;;  %v923_v21 = vadd.f32 %v5170_v9, %v4708_v28 }
 0x1ab   : > { %5923 = vst [vmem:[#allocation22_spill] sm:$0xff] %v5175_v19 }
 0x1ac   : > { %4131 = vmatmul.msk.f32.gmra.mxu1 %vm317_vm0, %v2112_v4  ;;  %4163 = vmatmul.msk.f32.gmra.mxu2 %vm317_vm0, %v2109_v59  ;;  %v2866_v59 = vld [vmem:[%s4512_s17 + $0x4d] sm:$0xff] }
 0x1ad   : > { %4200 = vmatmul.msk.f32.gmra.mxu3 %vm317_vm0, %v2865_v6  ;;  %4236 = vmatmul.msk.f32.gmra.mxu0 %vm317_vm0, %v3243_v22  ;;  %v3244_v6 = vld [vmem:[%s4512_s17 + $0x46] sm:$0xff] }
 0x1af   : > { %v1201_v57 = vpop.f32.mrf.mxu2 }
 0x1b0   : > { %v1297_v15 = vadd.f32 %v1201_v57, %v918_v55  ;;  %v1580_v48 = vpop.f32.mrf.mxu3 }
 0x1b1   : > { %v5185_v47 = vpop.f32.mrf.mxu1 }
 0x1b2   : > { %v5188_v41 = vadd.f32 %v1580_v48, %v1297_v15  ;;  %v5190_v19 = vpop.f32.mrf.mxu0  ;;  %v2114_v15 = vld [vmem:[%s4512_s17 + $0x6c] sm:$0xff]  ;;  %v924_v28 = vadd.f32 %v5185_v47, %v4723_v35 }
 0x1b3   : > { %5924 = vst [vmem:[#allocation23_spill] sm:$0xff] %v5190_v19 }
 0x1b4   : > { %4132 = vmatmul.msk.f32.gmra.mxu1 %vm317_vm0, %v2113_v54  ;;  %4164 = vmatmul.msk.f32.gmra.mxu2 %vm317_vm0, %v2110_v45  ;;  %v2867_v45 = vld [vmem:[%s4512_s17 + $0x55] sm:$0xff] }
 0x1b5   : > { %4201 = vmatmul.msk.f32.gmra.mxu3 %vm317_vm0, %v2866_v59  ;;  %4237 = vmatmul.msk.f32.gmra.mxu0 %vm317_vm0, %v3244_v6  ;;  %v3245_v59 = vld [vmem:[%s4512_s17 + $0x4e] sm:$0xff] }
 0x1b7   : > { %v1204_v52 = vpop.f32.mrf.mxu2 }
 0x1b8   : > { %v1298_v22 = vadd.f32 %v1204_v52, %v919_v62  ;;  %v1583_v55 = vpop.f32.mrf.mxu3 }
 0x1b9   : > { %v5200_v57 = vpop.f32.mrf.mxu1 }
 0x1ba   : > { %v5203_v48 = vadd.f32 %v1583_v55, %v1298_v22  ;;  %v5205_v19 = vpop.f32.mrf.mxu0  ;;  %v2115_v22 = vld [vmem:[%s4512_s17 + $0x74] sm:$0xff]  ;;  %v925_v35 = vadd.f32 %v5200_v57, %v4738_v42 }
 0x1bb   : > { %5926 = vst [vmem:[#allocation25_spill] sm:$0xff] %v5205_v19 }
 0x1bc   : > { %5925 = vst [vmem:[#allocation24_spill] sm:$0xff] %v5203_v48  ;;  %4133 = vmatmul.msk.f32.gmra.mxu1 %vm317_vm0, %v2114_v15  ;;  %4165 = vmatmul.msk.f32.gmra.mxu2 %vm317_vm0, %v2111_v3  ;;  %v2868_v3 = vld [vmem:[%s4512_s17 + $0x5d] sm:$0xff] }
 0x1bd   : > { %4202 = vmatmul.msk.f32.gmra.mxu3 %vm317_vm0, %v2867_v45  ;;  %4238 = vmatmul.msk.f32.gmra.mxu0 %vm317_vm0, %v3245_v59  ;;  %v3246_v45 = vld [vmem:[%s4512_s17 + $0x56] sm:$0xff] }
 0x1bf   : > { %v1207_v50 = vpop.f32.mrf.mxu2 }
 0x1c0   : > { %v1299_v6 = vadd.f32 %v1207_v50, %v920_v11  ;;  %v1586_v62 = vpop.f32.mrf.mxu3 }
 0x1c1   : > { %v5215_v52 = vpop.f32.mrf.mxu1 }
 0x1c2   : > { %v5218_v55 = vadd.f32 %v1586_v62, %v1299_v6  ;;  %v5220_v19 = vpop.f32.mrf.mxu0  ;;  %v2116_v6 = vld [vmem:[%s4512_s17 + $0x7c] sm:$0xff]  ;;  %v926_v42 = vadd.f32 %v5215_v52, %v4753_v49 }
 0x1c3   : > { %5928 = vst [vmem:[#allocation27_spill] sm:$0xff] %v5220_v19 }
 0x1c4   : > { %5927 = vst [vmem:[#allocation26_spill] sm:$0xff] %v5218_v55  ;;  %4134 = vmatmul.msk.f32.gmra.mxu1 %vm317_vm0, %v2115_v22  ;;  %4166 = vmatmul.msk.f32.gmra.mxu2 %vm317_vm0, %v2112_v4  ;;  %v2869_v4 = vld [vmem:[%s4512_s17 + $0x65] sm:$0xff] }
 0x1c5   : > { %4203 = vmatmul.msk.f32.gmra.mxu3 %vm317_vm0, %v2868_v3  ;;  %4239 = vmatmul.msk.f32.gmra.mxu0 %vm317_vm0, %v3246_v45  ;;  %v3247_v3 = vld [vmem:[%s4512_s17 + $0x5e] sm:$0xff] }
 0x1c7   : > { %v1210_v43 = vpop.f32.mrf.mxu2 }
 0x1c8   : > { %v1300_v59 = vadd.f32 %v1210_v43, %v921_v7  ;;  %v1589_v11 = vpop.f32.mrf.mxu3 }
 0x1c9   : > { %v5230_v50 = vpop.f32.mrf.mxu1 }
 0x1ca   : > { %v5233_v62 = vadd.f32 %v1589_v11, %v1300_v59  ;;  %v5235_v48 = vpop.f32.mrf.mxu0  ;;  %v2117_v59 = vld [vmem:[%s4512_s17 + $0x84] sm:$0xff]  ;;  %v927_v49 = vadd.f32 %v5230_v50, %v4768_v56 }
 0x1cb   : > { %5930 = vst [vmem:[#allocation29_spill] sm:$0xff] %v5235_v48 }
 0x1cc   : > { %5929 = vst [vmem:[#allocation28_spill] sm:$0xff] %v5233_v62  ;;  %4135 = vmatmul.msk.f32.gmra.mxu1 %vm317_vm0, %v2116_v6  ;;  %4167 = vmatmul.msk.f32.gmra.mxu2 %vm317_vm0, %v2113_v54  ;;  %v2870_v54 = vld [vmem:[%s4512_s17 + $0x6d] sm:$0xff] }
 0x1cd   : > { %4204 = vmatmul.msk.f32.gmra.mxu3 %vm317_vm0, %v2869_v4  ;;  %4240 = vmatmul.msk.f32.gmra.mxu0 %vm317_vm0, %v3247_v3  ;;  %v3248_v4 = vld [vmem:[%s4512_s17 + $0x66] sm:$0xff] }
 0x1cf   : > { %v1213_v39 = vpop.f32.mrf.mxu2 }
 0x1d0   : > { %v1301_v45 = vadd.f32 %v1213_v39, %v922_v14  ;;  %v1592_v7 = vpop.f32.mrf.mxu3 }
 0x1d1   : > { %v5245_v43 = vpop.f32.mrf.mxu1 }
 0x1d2   : > { %v5248_v11 = vadd.f32 %v1592_v7, %v1301_v45  ;;  %v5250_v19 = vpop.f32.mrf.mxu0  ;;  %v2118_v45 = vld [vmem:[%s4512_s17 + $0x8c] sm:$0xff]  ;;  %v928_v56 = vadd.f32 %v5245_v43, %v4783_v63 }
 0x1d3   : > { %5932 = vst [vmem:[#allocation31_spill] sm:$0xff] %v5250_v19 }
 0x1d4   : > { %5931 = vst [vmem:[#allocation30_spill] sm:$0xff] %v5248_v11  ;;  %4136 = vmatmul.msk.f32.gmra.mxu1 %vm317_vm0, %v2117_v59  ;;  %4168 = vmatmul.msk.f32.gmra.mxu2 %vm317_vm0, %v2114_v15  ;;  %v2871_v15 = vld [vmem:[%s4512_s17 + $0x75] sm:$0xff]  ;;  %v3268_v11 = vld [vmem:[%s4512_s17 + $0x106] sm:$0xff] }
 0x1d5   : > { %4205 = vmatmul.msk.f32.gmra.mxu3 %vm317_vm0, %v2870_v54  ;;  %4241 = vmatmul.msk.f32.gmra.mxu0 %vm317_vm0, %v3248_v4  ;;  %v3249_v54 = vld [vmem:[%s4512_s17 + $0x6e] sm:$0xff] }
 0x1d7   : > { %v1216_v10 = vpop.f32.mrf.mxu2 }
 0x1d8   : > { %v1302_v3 = vadd.f32 %v1216_v10, %v923_v21  ;;  %v1595_v14 = vpop.f32.mrf.mxu3 }
 0x1d9   : > { %v5260_v39 = vpop.f32.mrf.mxu1 }
 0x1da   : > { %v5263_v7 = vadd.f32 %v1595_v14, %v1302_v3  ;;  %v5265_v55 = vpop.f32.mrf.mxu0  ;;  %v2119_v3 = vld [vmem:[%s4512_s17 + $0x94] sm:$0xff]  ;;  %v929_v63 = vadd.f32 %v5260_v39, %v4798_v12 }
 0x1db   : > { %5934 = vst [vmem:[#allocation33_spill] sm:$0xff] %v5265_v55 }
 0x1dc   : > { %5933 = vst [vmem:[#allocation32_spill] sm:$0xff] %v5263_v7  ;;  %4137 = vmatmul.msk.f32.gmra.mxu1 %vm317_vm0, %v2118_v45  ;;  %4169 = vmatmul.msk.f32.gmra.mxu2 %vm317_vm0, %v2115_v22  ;;  %v2872_v22 = vld [vmem:[%s4512_s17 + $0x7d] sm:$0xff]  ;;  %v2891_v7 = vld [vmem:[%s4512_s17 + $0x115] sm:$0xff] }
 0x1dd   : > { %4206 = vmatmul.msk.f32.gmra.mxu3 %vm317_vm0, %v2871_v15  ;;  %4242 = vmatmul.msk.f32.gmra.mxu0 %vm317_vm0, %v3249_v54  ;;  %v3250_v15 = vld [vmem:[%s4512_s17 + $0x76] sm:$0xff] }
 0x1df   : > { %v1219_v9 = vpop.f32.mrf.mxu2 }
 0x1e0   : > { %v1303_v4 = vadd.f32 %v1219_v9, %v924_v28  ;;  %v1598_v21 = vpop.f32.mrf.mxu3 }
 0x1e1   : > { %v5275_v10 = vpop.f32.mrf.mxu1 }
 0x1e2   : > { %v5278_v14 = vadd.f32 %v1598_v21, %v1303_v4  ;;  %v5280_v48 = vpop.f32.mrf.mxu0  ;;  %v2120_v4 = vld [vmem:[%s4512_s17 + $0x9c] sm:$0xff] }
 0x1e3   : > { %5936 = vst [vmem:[#allocation35_spill] sm:$0xff] %v5280_v48  ;;  %v3269_v48 = vld [vmem:[%s4512_s17 + $0x10e] sm:$0xff] }
 0x1e4   : > { %5935 = vst [vmem:[#allocation34_spill] sm:$0xff] %v5278_v14  ;;  %4138 = vmatmul.msk.f32.gmra.mxu1 %vm317_vm0, %v2119_v3  ;;  %4170 = vmatmul.msk.f32.gmra.mxu2 %vm317_vm0, %v2116_v6  ;;  %v2873_v6 = vld [vmem:[%s4512_s17 + $0x85] sm:$0xff] }
 0x1e5   : > { %4207 = vmatmul.msk.f32.gmra.mxu3 %vm317_vm0, %v2872_v22  ;;  %4243 = vmatmul.msk.f32.gmra.mxu0 %vm317_vm0, %v3250_v15  ;;  %v3251_v22 = vld [vmem:[%s4512_s17 + $0x7e] sm:$0xff] }
 0x1e7   : > { %v1222_v47 = vpop.f32.mrf.mxu2 }
 0x1e8   : > { %v1304_v54 = vadd.f32 %v1222_v47, %v925_v35  ;;  %v1601_v28 = vpop.f32.mrf.mxu3 }
 0x1e9   : > { %v5290_v9 = vpop.f32.mrf.mxu1 }
 0x1ea   : > { %v5293_v21 = vadd.f32 %v1601_v28, %v1304_v54  ;;  %v5295_v62 = vpop.f32.mrf.mxu0  ;;  %v2121_v54 = vld [vmem:[%s4512_s17 + $0xa4] sm:$0xff] }
 0x1eb   : > { %5938 = vst [vmem:[#allocation37_spill] sm:$0xff] %v5295_v62 }
 0x1ec   : > { %5937 = vst [vmem:[#allocation36_spill] sm:$0xff] %v5293_v21  ;;  %4139 = vmatmul.msk.f32.gmra.mxu1 %vm317_vm0, %v2120_v4  ;;  %4171 = vmatmul.msk.f32.gmra.mxu2 %vm317_vm0, %v2117_v59  ;;  %v2874_v59 = vld [vmem:[%s4512_s17 + $0x8d] sm:$0xff] }
 0x1ed   : > { %4208 = vmatmul.msk.f32.gmra.mxu3 %vm317_vm0, %v2873_v6  ;;  %4244 = vmatmul.msk.f32.gmra.mxu0 %vm317_vm0, %v3251_v22  ;;  %v3252_v6 = vld [vmem:[%s4512_s17 + $0x86] sm:$0xff] }
 0x1ef   : > { %v1225_v57 = vpop.f32.mrf.mxu2 }
 0x1f0   : > { %v1305_v15 = vadd.f32 %v1225_v57, %v926_v42  ;;  %v1604_v35 = vpop.f32.mrf.mxu3 }
 0x1f1   : > { %v5305_v47 = vpop.f32.mrf.mxu1 }
 0x1f2   : > { %v5308_v28 = vadd.f32 %v1604_v35, %v1305_v15  ;;  %v5310_v62 = vpop.f32.mrf.mxu0  ;;  %v2122_v15 = vld [vmem:[%s4512_s17 + $0xac] sm:$0xff] }
 0x1f3   : > { %5940 = vst [vmem:[#allocation39_spill] sm:$0xff] %v5310_v62 }
 0x1f4   : > { %5939 = vst [vmem:[#allocation38_spill] sm:$0xff] %v5308_v28  ;;  %4140 = vmatmul.msk.f32.gmra.mxu1 %vm317_vm0, %v2121_v54  ;;  %4172 = vmatmul.msk.f32.gmra.mxu2 %vm317_vm0, %v2118_v45  ;;  %v2875_v45 = vld [vmem:[%s4512_s17 + $0x95] sm:$0xff] }
 0x1f5   : > { %4209 = vmatmul.msk.f32.gmra.mxu3 %vm317_vm0, %v2874_v59  ;;  %4245 = vmatmul.msk.f32.gmra.mxu0 %vm317_vm0, %v3252_v6  ;;  %v3253_v59 = vld [vmem:[%s4512_s17 + $0x8e] sm:$0xff] }
 0x1f7   : > { %v1228_v52 = vpop.f32.mrf.mxu2 }
 0x1f8   : > { %v1306_v22 = vadd.f32 %v1228_v52, %v927_v49  ;;  %v1607_v42 = vpop.f32.mrf.mxu3 }
 0x1f9   : > { %v5320_v57 = vpop.f32.mrf.mxu1 }
 0x1fa   : > { %v5323_v35 = vadd.f32 %v1607_v42, %v1306_v22  ;;  %v5325_v62 = vpop.f32.mrf.mxu0  ;;  %v2123_v22 = vld [vmem:[%s4512_s17 + $0xb4] sm:$0xff] }
 0x1fb   : > { %5942 = vst [vmem:[#allocation41_spill] sm:$0xff] %v5325_v62 }
 0x1fc   : > { %5941 = vst [vmem:[#allocation40_spill] sm:$0xff] %v5323_v35  ;;  %4141 = vmatmul.msk.f32.gmra.mxu1 %vm317_vm0, %v2122_v15  ;;  %4173 = vmatmul.msk.f32.gmra.mxu2 %vm317_vm0, %v2119_v3  ;;  %v2876_v3 = vld [vmem:[%s4512_s17 + $0x9d] sm:$0xff] }
 0x1fd   : > { %4210 = vmatmul.msk.f32.gmra.mxu3 %vm317_vm0, %v2875_v45  ;;  %4246 = vmatmul.msk.f32.gmra.mxu0 %vm317_vm0, %v3253_v59  ;;  %v3254_v45 = vld [vmem:[%s4512_s17 + $0x96] sm:$0xff] }
 0x1ff   : > { %v1231_v50 = vpop.f32.mrf.mxu2 }
 0x200   : > { %v1307_v6 = vadd.f32 %v1231_v50, %v928_v56  ;;  %v1610_v49 = vpop.f32.mrf.mxu3 }
 0x201   : > { %v5335_v52 = vpop.f32.mrf.mxu1 }
 0x202   : > { %v5338_v42 = vadd.f32 %v1610_v49, %v1307_v6  ;;  %v5340_v28 = vpop.f32.mrf.mxu0  ;;  %v2124_v6 = vld [vmem:[%s4512_s17 + $0xbc] sm:$0xff] }
 0x203   : > { %5944 = vst [vmem:[#allocation43_spill] sm:$0xff] %v5340_v28 }
 0x204   : > { %5943 = vst [vmem:[#allocation42_spill] sm:$0xff] %v5338_v42  ;;  %4142 = vmatmul.msk.f32.gmra.mxu1 %vm317_vm0, %v2123_v22  ;;  %4174 = vmatmul.msk.f32.gmra.mxu2 %vm317_vm0, %v2120_v4  ;;  %v2877_v4 = vld [vmem:[%s4512_s17 + $0xa5] sm:$0xff] }
 0x205   : > { %4211 = vmatmul.msk.f32.gmra.mxu3 %vm317_vm0, %v2876_v3  ;;  %4247 = vmatmul.msk.f32.gmra.mxu0 %vm317_vm0, %v3254_v45  ;;  %v3255_v3 = vld [vmem:[%s4512_s17 + $0x9e] sm:$0xff]  ;;  %v2031_v45 = vadd.f32 %v4818_v44, %v4816_v40  ;;  %v2878_v44 = vld [vmem:[%s4512_s17 + $0xad] sm:$0xff] }
 0x207   : > { %v1234_v43 = vpop.f32.mrf.mxu2  ;;  %v2410_v12 = vadd.f32 %v5275_v10, %v2031_v45 }
 0x208   : > { %v1308_v59 = vadd.f32 %v1234_v43, %v929_v63  ;;  %v1613_v56 = vpop.f32.mrf.mxu3 }
 0x209   : > { %v5350_v50 = vpop.f32.mrf.mxu1 }
 0x20a   : > { %v5353_v49 = vadd.f32 %v1613_v56, %v1308_v59  ;;  %v5355_v62 = vpop.f32.mrf.mxu0  ;;  %v2125_v56 = vld [vmem:[%s4512_s17 + $0xc4] sm:$0xff] }
 0x20b   : > { %5946 = vst [vmem:[#allocation45_spill] sm:$0xff] %v5355_v62 }
 0x20c   : > { %5945 = vst [vmem:[#allocation44_spill] sm:$0xff] %v5353_v49  ;;  %4143 = vmatmul.msk.f32.gmra.mxu1 %vm317_vm0, %v2124_v6  ;;  %4175 = vmatmul.msk.f32.gmra.mxu2 %vm317_vm0, %v2121_v54  ;;  %v3256_v54 = vld [vmem:[%s4512_s17 + $0xa6] sm:$0xff]  ;;  %v3257_v49 = vld [vmem:[%s4512_s17 + $0xae] sm:$0xff] }
 0x20d   : > { %4212 = vmatmul.msk.f32.gmra.mxu3 %vm317_vm0, %v2877_v4  ;;  %4248 = vmatmul.msk.f32.gmra.mxu0 %vm317_vm0, %v3255_v3  ;;  %v2032_v4 = vadd.f32 %v4833_v61, %v4831_v60  ;;  %v2879_v61 = vld [vmem:[%s4512_s17 + $0xb5] sm:$0xff] }
 0x20f   : > { %v2645_v39 = vpop.f32.mrf.mxu2  ;;  %v2411_v10 = vadd.f32 %v5290_v9, %v2032_v4 }
 0x210   : > { %v2789_v63 = vadd.f32 %v2645_v39, %v2410_v12  ;;  %v3024_v43 = vpop.f32.mrf.mxu3 }
 0x211   : > { %v5366_v59 = vpop.f32.mrf.mxu1 }
 0x212   : > { %v5369_v62 = vadd.f32 %v3024_v43, %v2789_v63  ;;  %v5371_v40 = vpop.f32.mrf.mxu0  ;;  %v2126_v63 = vld [vmem:[%s4512_s17 + $0xcc] sm:$0xff] }
 0x213   : > { %5948 = vst [vmem:[#allocation47_spill] sm:$0xff] %v5371_v40 }
 0x214   : > { %5947 = vst [vmem:[#allocation46_spill] sm:$0xff] %v5369_v62  ;;  %4144 = vmatmul.msk.f32.gmra.mxu1 %vm317_vm0, %v2125_v56  ;;  %4176 = vmatmul.msk.f32.gmra.mxu2 %vm317_vm0, %v2122_v15  ;;  %v2033_v15 = vadd.f32 %v4848_v32, %v4846_v30  ;;  %v5959_v62 = vld [vmem:[#allocation14_spill] sm:$0xff] }
 0x215   : > { %4213 = vmatmul.msk.f32.gmra.mxu3 %vm317_vm0, %v2878_v44  ;;  %4249 = vmatmul.msk.f32.gmra.mxu0 %vm317_vm0, %v3256_v54  ;;  %v2039_v54 = vadd.f32 %v4938_v17, %v4936_v37 }
 0x216   : > { %v2412_v9 = vadd.f32 %v5305_v47, %v2033_v15  ;;  %v2034_v47 = vadd.f32 %v4863_v53, %v4861_v51  ;;  %v2881_v53 = vld [vmem:[%s4512_s17 + $0xc5] sm:$0xff] }
 0x217   : > { %v2648_v3 = vpop.f32.mrf.mxu2 }
 0x218   : > { %v2790_v45 = vadd.f32 %v2648_v3, %v2411_v10  ;;  %v3027_v12 = vpop.f32.mrf.mxu3  ;;  %v2413_v37 = vadd.f32 %v5320_v57, %v2034_v47  ;;  %v2129_v47 = vld [vmem:[%s4512_s17 + $0xe4] sm:$0xff] }
 0x219   : > { %v5382_v39 = vpop.f32.mrf.mxu1 }
 0x21a   : > { %v5385_v43 = vadd.f32 %v3027_v12, %v2790_v45  ;;  %v5387_v60 = vpop.f32.mrf.mxu0  ;;  %v2127_v45 = vld [vmem:[%s4512_s17 + $0xd4] sm:$0xff]  ;;  %v2880_v12 = vld [vmem:[%s4512_s17 + $0xbd] sm:$0xff] }
 0x21b   : > { %5950 = vst [vmem:[#allocation49_spill] sm:$0xff] %v5387_v60 }
 0x21c   : > { %5949 = vst [vmem:[#allocation48_spill] sm:$0xff] %v5385_v43  ;;  %4145 = vmatmul.msk.f32.gmra.mxu1 %vm317_vm0, %v2126_v63  ;;  %4177 = vmatmul.msk.f32.gmra.mxu2 %vm317_vm0, %v2123_v22 }
 0x21d   : > { %4214 = vmatmul.msk.f32.gmra.mxu3 %vm317_vm0, %v2879_v61  ;;  %4250 = vmatmul.msk.f32.gmra.mxu0 %vm317_vm0, %v3257_v49  ;;  %v3258_v49 = vld [vmem:[%s4512_s17 + $0xb6] sm:$0xff] }
 0x21f   : > { %v2651_v44 = vpop.f32.mrf.mxu2 }
 0x220   : > { %v2791_v4 = vadd.f32 %v2651_v44, %v2412_v9  ;;  %v3030_v10 = vpop.f32.mrf.mxu3  ;;  %v2128_v44 = vld [vmem:[%s4512_s17 + $0xdc] sm:$0xff] }
 0x221   : > { %v2290_v3 = vpop.f32.mrf.mxu1 }
 0x222   : > { %v5401_v30 = vadd.f32 %v2290_v3, %v2039_v54  ;;  %v5403_v32 = vadd.f32 %v3030_v10, %v2791_v4  ;;  %v5405_v22 = vpop.f32.mrf.mxu0  ;;  %v2035_v4 = vadd.f32 %v4878_v26, %v4876_v18  ;;  %v2882_v26 = vld [vmem:[%s4512_s17 + $0xcd] sm:$0xff] }
 0x223   : > { %5952 = vst [vmem:[#allocation51_spill] sm:$0xff] %v5405_v22  ;;  %v3270_v22 = vld [vmem:[%s4512_s17 + $0x116] sm:$0xff] }
 0x224   : > { %5951 = vst [vmem:[#allocation50_spill] sm:$0xff] %v5403_v32  ;;  %4146 = vmatmul.msk.f32.gmra.mxu1 %vm317_vm0, %v2127_v45  ;;  %4178 = vmatmul.msk.f32.gmra.mxu2 %vm317_vm0, %v2124_v6  ;;  %v3259_v6 = vld [vmem:[%s4512_s17 + $0xbe] sm:$0xff]  ;;  %v2414_v57 = vadd.f32 %v5335_v52, %v2035_v4  ;;  %v2130_v4 = vld [vmem:[%s4512_s17 + $0xec] sm:$0xff] }
 0x225   : > { %4215 = vmatmul.msk.f32.gmra.mxu3 %vm317_vm0, %v2880_v12  ;;  %4251 = vmatmul.msk.f32.gmra.mxu0 %vm317_vm0, %v3258_v49  ;;  %v5960_v32 = vld [vmem:[#allocation11_spill] sm:$0xff] }
 0x227   : > { %v2654_v17 = vpop.f32.mrf.mxu2 }
 0x228   : > { %v2792_v61 = vadd.f32 %v2654_v17, %v2413_v37  ;;  %v3033_v15 = vpop.f32.mrf.mxu3  ;;  %v2036_v17 = vadd.f32 %v4893_v58, %v4891_v36  ;;  %v2883_v58 = vld [vmem:[%s4512_s17 + $0xd5] sm:$0xff] }
 0x229   : > { %v5416_v9 = vpop.f32.mrf.mxu1 }
 0x22a   : > { %v5419_v54 = vadd.f32 %v3033_v15, %v2792_v61  ;;  %v5421_v51 = vpop.f32.mrf.mxu0  ;;  %v2415_v52 = vadd.f32 %v5350_v50, %v2036_v17  ;;  %v2131_v17 = vld [vmem:[%s4512_s17 + $0xf4] sm:$0xff] }
 0x22c   : > { %4147 = vmatmul.msk.f32.gmra.mxu1 %vm317_vm0, %v2128_v44  ;;  %4179 = vmatmul.msk.f32.gmra.mxu2 %vm317_vm0, %v2125_v56  ;;  %v3260_v56 = vld [vmem:[%s4512_s17 + $0xc6] sm:$0xff] }
 0x22d   : > { %4216 = vmatmul.msk.f32.gmra.mxu3 %vm317_vm0, %v2881_v53  ;;  %4252 = vmatmul.msk.f32.gmra.mxu0 %vm317_vm0, %v3259_v6 }
 0x22f   : > { %v2657_v10 = vpop.f32.mrf.mxu2 }
 0x230   : > { %v2793_v3 = vadd.f32 %v2657_v10, %v2414_v57  ;;  %v3036_v12 = vpop.f32.mrf.mxu3  ;;  %v2037_v10 = vadd.f32 %v4908_v31, %v4906_v33  ;;  %v2884_v31 = vld [vmem:[%s4512_s17 + $0xdd] sm:$0xff] }
 0x231   : > { %v5432_v49 = vpop.f32.mrf.mxu1 }
 0x232   : > { %v5435_v37 = vadd.f32 %v3036_v12, %v2793_v3  ;;  %v5437_v18 = vpop.f32.mrf.mxu0  ;;  %v2416_v50 = vadd.f32 %v5366_v59, %v2037_v10  ;;  %v2132_v10 = vld [vmem:[%s4512_s17 + $0xfc] sm:$0xff] }
 0x234   : > { %4148 = vmatmul.msk.f32.gmra.mxu1 %vm317_vm0, %v2129_v47  ;;  %4180 = vmatmul.msk.f32.gmra.mxu2 %vm317_vm0, %v2126_v63  ;;  %v3261_v63 = vld [vmem:[%s4512_s17 + $0xce] sm:$0xff] }
 0x235   : > { %4217 = vmatmul.msk.f32.gmra.mxu3 %vm317_vm0, %v2882_v26  ;;  %4253 = vmatmul.msk.f32.gmra.mxu0 %vm317_vm0, %v3260_v56 }
 0x237   : > { %v2660_v61 = vpop.f32.mrf.mxu2 }
 0x238   : > { %v2794_v15 = vadd.f32 %v2660_v61, %v2415_v52  ;;  %v3039_v53 = vpop.f32.mrf.mxu3  ;;  %v2038_v61 = vadd.f32 %v4923_v16, %v4921_v38  ;;  %v2885_v16 = vld [vmem:[%s4512_s17 + $0xe5] sm:$0xff] }
 0x239   : > { %v5448_v6 = vpop.f32.mrf.mxu1 }
 0x23a   : > { %v5451_v57 = vadd.f32 %v3039_v53, %v2794_v15  ;;  %v5453_v36 = vpop.f32.mrf.mxu0  ;;  %v2417_v59 = vadd.f32 %v5382_v39, %v2038_v61 }
 0x23c   : > { %4149 = vmatmul.msk.f32.gmra.mxu1 %vm317_vm0, %v2130_v4  ;;  %4181 = vmatmul.msk.f32.gmra.mxu2 %vm317_vm0, %v2127_v45  ;;  %v3262_v45 = vld [vmem:[%s4512_s17 + $0xd6] sm:$0xff] }
 0x23d   : > { %4218 = vmatmul.msk.f32.gmra.mxu3 %vm317_vm0, %v2883_v58  ;;  %4254 = vmatmul.msk.f32.gmra.mxu0 %vm317_vm0, %v3261_v63 }
 0x23f   : > { %v2663_v3 = vpop.f32.mrf.mxu2 }
 0x240   : > { %v2795_v12 = vadd.f32 %v2663_v3, %v2416_v50  ;;  %v3042_v26 = vpop.f32.mrf.mxu3 }
 0x241   : > { %v5464_v56 = vpop.f32.mrf.mxu1 }
 0x242   : > { %v5467_v52 = vadd.f32 %v3042_v26, %v2795_v12  ;;  %v5469_v33 = vpop.f32.mrf.mxu0 }
 0x244   : > { %4150 = vmatmul.msk.f32.gmra.mxu1 %vm317_vm0, %v2131_v17  ;;  %4182 = vmatmul.msk.f32.gmra.mxu2 %vm317_vm0, %v2128_v44  ;;  %v3263_v44 = vld [vmem:[%s4512_s17 + $0xde] sm:$0xff] }
 0x245   : > { %4219 = vmatmul.msk.f32.gmra.mxu3 %vm317_vm0, %v2884_v31  ;;  %4255 = vmatmul.msk.f32.gmra.mxu0 %vm317_vm0, %v3262_v45  ;;  %v2133_v31 = vld [vmem:[%s4512_s17 + $0x104] sm:$0xff] }
 0x247   : > { %v2666_v15 = vpop.f32.mrf.mxu2 }
 0x248   : > { %v2796_v53 = vadd.f32 %v2666_v15, %v2417_v59  ;;  %v3045_v58 = vpop.f32.mrf.mxu3  ;;  %v2886_v59 = vld [vmem:[%s4512_s17 + $0xed] sm:$0xff] }
 0x249   : > { %v5480_v63 = vpop.f32.mrf.mxu1  ;;  %v3264_v15 = vld [vmem:[%s4512_s17 + $0xe6] sm:$0xff] }
 0x24a   : > { %v5483_v50 = vadd.f32 %v3045_v58, %v2796_v53  ;;  %v5485_v38 = vpop.f32.mrf.mxu0 }
 0x24c   : > { %4151 = vmatmul.msk.f32.gmra.mxu1 %vm317_vm0, %v2132_v10  ;;  %4183 = vmatmul.msk.f32.gmra.mxu2 %vm317_vm0, %v2129_v47 }
 0x24d   : > { %4220 = vmatmul.msk.f32.gmra.mxu3 %vm317_vm0, %v2885_v16  ;;  %4256 = vmatmul.msk.f32.gmra.mxu0 %vm317_vm0, %v3263_v44  ;;  %v2134_v16 = vld [vmem:[%s4512_s17 + $0x10c] sm:$0xff] }
 0x24f   : > { %v2669_v39 = vpop.f32.mrf.mxu2 }
 0x250   : > { %v2797_v3 = vadd.f32 %v2669_v39, %v5401_v30  ;;  %v3048_v12 = vpop.f32.mrf.mxu3  ;;  %v2887_v39 = vld [vmem:[%s4512_s17 + $0xf5] sm:$0xff] }
 0x251   : > { %v5494_v26 = vpop.f32.mrf.mxu1 }
 0x252   : > { %v3176_v45 = vadd.f32 %v3048_v12, %v2797_v3  ;;  %v3427_v61 = vpop.f32.mrf.mxu0  ;;  %v3265_v3 = vld [vmem:[%s4512_s17 + $0xee] sm:$0xff]  ;;  %v2047_v12 = vadd.f32 %v5070_v8, %v5068_v46  ;;  %v2048_v8 = vadd.f32 %v5085_v2, %v5083_v5  ;;  %v2049_v2 = vadd.f32 %v5100_v23, %v5098_v0 }
 0x253   : > { %v2050_v23 = vadd.f32 %v5115_v29, %v5113_v25  ;;  %v2045_v25 = vadd.f32 %v5031_v24, %v5029_v1  ;;  %v2892_v1 = vld [vmem:[%s4512_s17 + $0x11d] sm:$0xff] }
 0x254   : > { %v5499_v53 = vadd.f32 %v3427_v61, %v3176_v45  ;;  %4152 = vmatmul.msk.f32.gmra.mxu1 %vm317_vm0, %v2133_v31  ;;  %4184 = vmatmul.msk.f32.gmra.mxu2 %vm317_vm0, %v2130_v4 }
 0x255   : > { %4221 = vmatmul.msk.f32.gmra.mxu3 %vm317_vm0, %v2886_v59  ;;  %4257 = vmatmul.msk.f32.gmra.mxu0 %vm317_vm0, %v3264_v15  ;;  %v2135_v59 = vld [vmem:[%s4512_s17 + $0x114] sm:$0xff]  ;;  %v2424_v14 = vadd.f32 %v5494_v26, %v2045_v25 }
 0x257   : > { %v5505_v30 = vpop.f32.mrf.mxu2 }
 0x258   : > { %v5507_v47 = vpop.f32.mrf.mxu3 }
 0x259   : > { %v5509_v58 = vpop.f32.mrf.mxu1 }
 0x25a   : > { %v5512_v44 = vpop.f32.mrf.mxu0 }
 0x25c   : > { %4153 = vmatmul.msk.f32.gmra.mxu1 %vm317_vm0, %v2134_v16  ;;  %4185 = vmatmul.msk.f32.gmra.mxu2 %vm317_vm0, %v2131_v17  ;;  %v2888_v17 = vld [vmem:[%s4512_s17 + $0xfd] sm:$0xff] }
 0x25d   : > { %4222 = vmatmul.msk.f32.gmra.mxu3 %vm317_vm0, %v2887_v39  ;;  %4258 = vmatmul.msk.f32.gmra.mxu0 %vm317_vm0, %v3265_v3  ;;  %v3266_v39 = vld [vmem:[%s4512_s17 + $0xf6] sm:$0xff] }
 0x25f   : > { %v5520_v4 = vpop.f32.mrf.mxu2 }
 0x260   : > { %v5524_v45 = vpop.f32.mrf.mxu3 }
 0x261   : > { %v2314_v61 = vpop.f32.mrf.mxu1 }
 0x262   : > { %v5527_v15 = vadd.f32 %v2314_v61, %v2047_v12  ;;  %v5529_v35 = vpop.f32.mrf.mxu0  ;;  %v2136_v61 = vld [vmem:[%s4512_s17 + $0x11c] sm:$0xff] }
 0x264   : > { %4154 = vmatmul.msk.f32.gmra.mxu1 %vm317_vm0, %v2135_v59  ;;  %4186 = vmatmul.msk.f32.gmra.mxu2 %vm317_vm0, %v2132_v10  ;;  %v2889_v10 = vld [vmem:[%s4512_s17 + $0x105] sm:$0xff] }
 0x265   : > { %4223 = vmatmul.msk.f32.gmra.mxu3 %vm317_vm0, %v2888_v17  ;;  %4259 = vmatmul.msk.f32.gmra.mxu0 %vm317_vm0, %v3266_v39  ;;  %v3267_v17 = vld [vmem:[%s4512_s17 + $0xfe] sm:$0xff] }
 0x267   : > { %v5537_v46 = vpop.f32.mrf.mxu2 }
 0x268   : > { %v5541_v3 = vpop.f32.mrf.mxu3 }
 0x269   : > { %v2317_v12 = vpop.f32.mrf.mxu1 }
 0x26a   : > { %v5544_v28 = vadd.f32 %v2317_v12, %v2048_v8  ;;  %v5546_v42 = vpop.f32.mrf.mxu0  ;;  %v5557_v12 = vld [vmem:[%s4512_s17 + $0x124] sm:$0xff] }
 0x26c   : > { %4155 = vmatmul.msk.f32.gmra.mxu1 %vm317_vm0, %v2136_v61  ;;  %4187 = vmatmul.msk.f32.gmra.mxu2 %vm317_vm0, %v2133_v31  ;;  %v2890_v31 = vld [vmem:[%s4512_s17 + $0x10d] sm:$0xff] }
 0x26d   : > { %4224 = vmatmul.msk.f32.gmra.mxu3 %vm317_vm0, %v2889_v10  ;;  %4260 = vmatmul.msk.f32.gmra.mxu0 %vm317_vm0, %v3267_v17 }
 0x26f   : > { %v2681_v5 = vpop.f32.mrf.mxu2 }
 0x270   : > { %v3060_v39 = vpop.f32.mrf.mxu3 }
 0x271   : > { %v2320_v8 = vpop.f32.mrf.mxu1 }
 0x272   : > { %v5559_v21 = vadd.f32 %v2320_v8, %v2049_v2  ;;  %v5561_v19 = vpop.f32.mrf.mxu0  ;;  %v5573_v2 = vld [vmem:[%s4512_s17 + $0x12c] sm:$0xff] }
 0x274   : > { %5953 = vst [vmem:[#allocation52_spill] sm:$0xff] %v5559_v21  ;;  %4156 = vmatmul.msk.f32.gmra.mxu1 %vm317_vm0, %v5557_v12  ;;  %4188 = vmatmul.msk.f32.gmra.mxu2 %vm317_vm0, %v2134_v16  ;;  %v5956_v16 = vld [vmem:[#allocation16_spill] sm:$0xff]  ;;  %v5962_v21 = vld [vmem:[#allocation17_spill] sm:$0xff] }
 0x275   : > { %4225 = vmatmul.msk.f32.gmra.mxu3 %vm317_vm0, %v2890_v31  ;;  %4261 = vmatmul.msk.f32.gmra.mxu0 %vm317_vm0, %v3268_v11  ;;  %v5955_v11 = vld [vmem:[#allocation15_spill] sm:$0xff] }
 0x276   : > { %v2044_v31 = vadd.f32 %v5956_v16, %v5955_v11  ;;  %v5961_v11 = vld [vmem:[#allocation12_spill] sm:$0xff] }
 0x277   : > { %v2684_v0 = vpop.f32.mrf.mxu2  ;;  %v2042_v16 = vadd.f32 %v5961_v11, %v5960_v32 }
 0x278   : > { %v3063_v10 = vpop.f32.mrf.mxu3 }
 0x279   : > { %v2323_v17 = vpop.f32.mrf.mxu1 }
 0x27a   : > { %v5575_v8 = vadd.f32 %v2323_v17, %v2050_v23  ;;  %v3442_v55 = vpop.f32.mrf.mxu0  ;;  %v5957_v23 = vld [vmem:[#allocation19_spill] sm:$0xff] }
 0x27b   : > { %v2051_v17 = vadd.f32 %v5957_v23, %v5128_v13  ;;  %v5963_v13 = vld [vmem:[#allocation18_spill] sm:$0xff] }
 0x27c   : > { %5954 = vst [vmem:[#allocation53_spill] sm:$0xff] %v5575_v8  ;;  %4157 = vmatmul.msk.f32.gmra.mxu1 %vm317_vm0, %v5573_v2  ;;  %4189 = vmatmul.msk.f32.gmra.mxu2 %vm317_vm0, %v2135_v59  ;;  %v5958_v59 = vld [vmem:[#allocation13_spill] sm:$0xff]  ;;  %v2046_v23 = vadd.f32 %v5963_v13, %v5962_v21  ;;  %v5967_v21 = vld [vmem:[#allocation8_spill] sm:$0xff] }
 0x27d   : > { %4226 = vmatmul.msk.f32.gmra.mxu3 %vm317_vm0, %v2891_v7  ;;  %4262 = vmatmul.msk.f32.gmra.mxu0 %vm317_vm0, %v3269_v48  ;;  %v2043_v60 = vadd.f32 %v5959_v62, %v5958_v59  ;;  %v2423_v7 = vadd.f32 %v5480_v63, %v2044_v31  ;;  %v5964_v62 = vld [vmem:[#allocation9_spill] sm:$0xff]  ;;  %v5965_v59 = vld [vmem:[#allocation10_spill] sm:$0xff]  ;;  %v5966_v31 = vld [vmem:[#allocation7_spill] sm:$0xff] }
 0x27e   : > { %v2041_v63 = vadd.f32 %v5965_v59, %v5964_v62  ;;  %v5969_v62 = vld [vmem:[#allocation21_spill] sm:$0xff] }
 0x27f   : > { %v2687_v29 = vpop.f32.mrf.mxu2  ;;  %v2422_v26 = vadd.f32 %v5464_v56, %v2043_v60  ;;  %v2802_v25 = vadd.f32 %v2684_v0, %v2423_v7 }
 0x280   : > { %v3066_v8 = vpop.f32.mrf.mxu3  ;;  %v2803_v48 = vadd.f32 %v2687_v29, %v2424_v14  ;;  %v2421_v14 = vadd.f32 %v5448_v6, %v2042_v16  ;;  %v2420_v60 = vadd.f32 %v5432_v49, %v2041_v63 }
 0x281   : > { %v2326_v40 = vpop.f32.mrf.mxu1  ;;  %v2801_v32 = vadd.f32 %v2681_v5, %v2422_v26  ;;  %v3271_v26 = vld [vmem:[%s4512_s17 + $0x11e] sm:$0xff] }
 0x282   : > { %v5594_v43 = vadd.f32 %v2326_v40, %v2051_v17  ;;  %v3445_v24 = vpop.f32.mrf.mxu0  ;;  %v2425_v40 = vadd.f32 %v5509_v58, %v2046_v23  ;;  %v3182_v29 = vadd.f32 %v3066_v8, %v2803_v48  ;;  %v2040_v17 = vadd.f32 %v5967_v21, %v5966_v31  ;;  %v2893_v23 = vld [vmem:[%s4512_s17 + $0x125] sm:$0xff] }
 0x283   : > { %v2800_v7 = vadd.f32 %v5537_v46, %v2421_v14  ;;  %v2799_v5 = vadd.f32 %v5520_v4, %v2420_v60  ;;  %v3180_v48 = vadd.f32 %v3060_v39, %v2801_v32  ;;  %v5626_v46 = vld [vmem:[%s5902_s3] ss:$0 sm:$0xff]  ;;  %v3272_v60 = vld [vmem:[%s4512_s17 + $0x126] sm:$0xff] }
 0x284   : > { %4190 = vmatmul.msk.f32.gmra.mxu2 %vm317_vm0, %v2136_v61  ;;  %v5968_v61 = vld [vmem:[#allocation20_spill] sm:$0xff]  ;;  %v2419_v58 = vadd.f32 %v5416_v9, %v2040_v17  ;;  %v3561_v11 = vadd.f32 %v3445_v24, %v3182_v29 }
 0x285   : > { %4227 = vmatmul.msk.f32.gmra.mxu3 %vm317_vm0, %v2892_v1  ;;  %4263 = vmatmul.msk.f32.gmra.mxu0 %vm317_vm0, %v3270_v22  ;;  %v2052_v0 = vadd.f32 %v5968_v61, %v5143_v20  ;;  %v3181_v22 = vadd.f32 %v3063_v10, %v2802_v25  ;;  %v3179_v9 = vadd.f32 %v5541_v3, %v2800_v7  ;;  %v2894_v17 = vld [vmem:[%s4512_s17 + $0x12d] sm:$0xff] }
 0x286   : > { %v2798_v20 = vadd.f32 %v5505_v30, %v2419_v58  ;;  %v3178_v39 = vadd.f32 %v5524_v45, %v2799_v5  ;;  %v3559_v30 = vadd.f32 %v5561_v19, %v3180_v48  ;;  %v3673_v24 = vadd.f32 %v5626_v46, %v3561_v11  ;;  %v2516_v11 = vld [vmem:[%s4512_s17 + $0x134] sm:$0xff] }
 0x287   : > { %v2690_v56 = vpop.f32.mrf.mxu2  ;;  %v3560_v10 = vadd.f32 %v3442_v55, %v3181_v22  ;;  %v2053_v3 = vadd.f32 %v5969_v62, %v5158_v27  ;;  %v3558_v45 = vadd.f32 %v5546_v42, %v3179_v9 }
 0x288   : > { %v2804_v1 = vadd.f32 %v2690_v56, %v2425_v40  ;;  %v3069_v6 = vpop.f32.mrf.mxu3  ;;  %v3177_v55 = vadd.f32 %v5507_v47, %v2798_v20  ;;  %v3557_v40 = vadd.f32 %v5529_v35, %v3178_v39  ;;  %v3671_v29 = vadd.f32 %v5626_v46, %v3559_v30 }
 0x289   : > { %v2329_v8 = vpop.f32.mrf.mxu1  ;;  %v3672_v59 = vadd.f32 %v5626_v46, %v3560_v10  ;;  %v3709_v31 = vmax.f32 %v3673_v24, 0.0  ;;  %v3670_v56 = vadd.f32 %v5626_v46, %v3558_v45  ;;  %v3550_v39 = vadd.f32 %v5421_v51, %v5419_v54  ;;  %v5972_v24 = vld [vmem:[#allocation52_spill] sm:$0xff]  ;;  %v2517_v45 = vld [vmem:[%s4512_s17 + $0x13c] sm:$0xff] }
 0x28a   : > { %v5618_v16 = vadd.f32 %v2329_v8, %v2052_v0  ;;  %v3183_v49 = vadd.f32 %v3069_v6, %v2804_v1  ;;  %v3448_v13 = vpop.f32.mrf.mxu0  ;;  %v3556_v42 = vadd.f32 %v5512_v44, %v3177_v55  ;;  %v3669_v35 = vadd.f32 %v5626_v46, %v3557_v40  ;;  %v5970_v44 = vld [vmem:[#allocation22_spill] sm:$0xff]  ;;  %v5975_v40 = vld [vmem:[#allocation48_spill] sm:$0xff] }
 0x28b   : > { %v3708_v61 = vmax.f32 %v3672_v59, 0.0  ;;  %v3707_v0 = vmax.f32 %v3671_v29, 0.0  ;;  %v2054_v7 = vadd.f32 %v5970_v44, %v5173_v34  ;;  %v3554_v1 = vadd.f32 %v5485_v38, %v5483_v50  ;;  %v5979_v44 = vld [vmem:[#allocation53_spill] sm:$0xff] }
 0x28c   : > { %v3562_v4 = vadd.f32 %v3448_v13, %v3183_v49  ;;  %4191 = vmatmul.msk.f32.gmra.mxu2 %vm317_vm0, %v5557_v12  ;;  %v3706_v5 = vmax.f32 %v3670_v56, 0.0  ;;  %v3553_v8 = vadd.f32 %v5469_v33, %v5467_v52  ;;  %v3667_v34 = vadd.f32 %v5626_v46, %v5499_v53 }
 0x28d   : > { %4228 = vmatmul.msk.f32.gmra.mxu3 %vm317_vm0, %v2893_v23  ;;  %4264 = vmatmul.msk.f32.gmra.mxu0 %vm317_vm0, %v3271_v26  ;;  %v3705_v38 = vmax.f32 %v3669_v35, 0.0  ;;  %v2895_v23 = vld [vmem:[%s4512_s17 + $0x135] sm:$0xff]  ;;  %v3666_v20 = vadd.f32 %v5626_v46, %v3554_v1  ;;  %v3551_v33 = vadd.f32 %v5437_v18, %v5435_v37 }
 0x28e   : > { %v3674_v25 = vadd.f32 %v5626_v46, %v3562_v4  ;;  %v3273_v26 = vld [vmem:[%s4512_s17 + $0x12e] sm:$0xff]  ;;  %v3665_v53 = vadd.f32 %v5626_v46, %v3553_v8  ;;  %v5973_v18 = vld [vmem:[#allocation50_spill] sm:$0xff] }
 0x28f   : > { %v2693_v12 = vpop.f32.mrf.mxu2  ;;  %v3702_v37 = vmax.f32 %v3666_v20, 0.0  ;;  %v3275_v8 = vld [vmem:[%s4512_s17 + $0x13e] sm:$0xff] }
 0x290   : > { %v3710_v63 = vmax.f32 %v3674_v25, 0.0  ;;  %v2805_v14 = vadd.f32 %v2693_v12, %v5527_v15  ;;  %v3072_v19 = vpop.f32.mrf.mxu3  ;;  %v3701_v51 = vmax.f32 %v3665_v53, 0.0 }
 0x291   : > { %v2332_v32 = vpop.f32.mrf.mxu1 }
 0x292   : > { %v5645_v27 = vadd.f32 %v2332_v32, %v2053_v3  ;;  %v3184_v21 = vadd.f32 %v3072_v19, %v2805_v14  ;;  %3742 = vmatpush.msrb.mxu1 %v3710_v63  ;;  %v3451_v47 = vpop.f32.mrf.mxu0  ;;  %v5974_v3 = vld [vmem:[#allocation51_spill] sm:$0xff]  ;;  %v3274_v19 = vld [vmem:[%s4512_s17 + $0x136] sm:$0xff] }
 0x293   : > { %v3549_v55 = vadd.f32 %v5974_v3, %v5973_v18  ;;  %v2896_v14 = vld [vmem:[%s4512_s17 + $0x13d] sm:$0xff]  ;;  %v5976_v32 = vld [vmem:[#allocation49_spill] sm:$0xff]  ;;  %s3859_s17 = sshll.u32 %s3855_s18, 4  ;;  %s3860_s17 = int_to_ptr.hbm [resolvable:$true] %s3859_s17 }
 0x294   : > { %v5651_v15 = vadd.f32 %v3451_v47, %v3184_v21  ;;  %4192 = vmatmul.msk.f32.gmra.mxu2 %vm317_vm0, %v5573_v2  ;;  %3743 = vmatpush.msrb.mxu1 %v3709_v31  ;;  %v3668_v2 = vadd.f32 %v5626_v46, %v3556_v42  ;;  %v3548_v29 = vadd.f32 %v5976_v32, %v5975_v40  ;;  %s4347_s8 = sshra.s32 %s3860_s17, 4  ;;  %s4348_s8 = int_to_ptr.hbm [resolvable:$true] %s4347_s8 }
 0x295   : > { %4229 = vmatmul.msk.f32.gmra.mxu3 %vm317_vm0, %v2894_v17  ;;  %4265 = vmatmul.msk.f32.gmra.mxu0 %vm317_vm0, %v3272_v60  ;;  %v3662_v31 = vadd.f32 %v5626_v46, %v3550_v39  ;;  %v5977_v17 = vld [vmem:[#allocation46_spill] sm:$0xff]  ;;  %v5978_v60 = vld [vmem:[#allocation47_spill] sm:$0xff]  ;;  %v3661_v56 = vadd.f32 %v5626_v46, %v3549_v55  ;;  %s4349_s11 = scalar_lea.hbm %s4348_s8, 1  ;;  %p4354_p1 = scmp.lt.s32.totalorder %s4348_s8, %s5905_s6 }
 0x296   : > { %3744 = vmatpush.msrb.mxu1 %v3708_v61  ;;  %v3704_v52 = vmax.f32 %v3668_v2, 0.0  ;;  %v3547_v42 = vadd.f32 %v5978_v60, %v5977_v17  ;;  %p4350_p12 = scmp.ne.s32.totalorder %s4348_s8, %s4349_s11  ;;  %p4355_p2 = scmp.lt.s32.totalorder %s4353_s13, %s4349_s11 }
 0x297   : > { %v2696_v22 = vpop.f32.mrf.mxu2  ;;  %v3698_v1 = vmax.f32 %v3662_v31, 0.0 }
 0x298   : > { %v2806_v6 = vadd.f32 %v2696_v22, %v5544_v28  ;;  %3745 = vmatpush.msrb.mxu1 %v3707_v0  ;;  %v3075_v58 = vpop.f32.mrf.mxu3  ;;  %v3552_v28 = vadd.f32 %v5453_v36, %v5451_v57  ;;  %v3703_v57 = vmax.f32 %v3667_v34, 0.0  ;;  %v5971_v36 = vld [vmem:[#allocation23_spill] sm:$0xff]  ;;  %v3660_v0 = vadd.f32 %v5626_v46, %v3548_v29  ;;  %p4351_p13 = pnand %p4350_p12, %p4489_p4  ;;  %p4356_p3 = por %p4355_p2, %p4354_p1 }
 0x299   : > { %v2335_v48 = vpop.f32.mrf.mxu1  ;;  %v2055_v10 = vadd.f32 %v5971_v36, %v5188_v41  ;;  %v3663_v41 = vadd.f32 %v5626_v46, %v3551_v33  ;;  %v3659_v2 = vadd.f32 %v5626_v46, %v3547_v42 }
 0x29a   : > { %v5669_v49 = vadd.f32 %v2335_v48, %v2054_v7  ;;  %v3185_v13 = vadd.f32 %v3075_v58, %v2806_v6  ;;  %3746 = vmatpush.msrb.mxu1 %v3706_v5  ;;  %v3454_v50 = vpop.f32.mrf.mxu0  ;;  %v3664_v30 = vadd.f32 %v5626_v46, %v3552_v28  ;;  %v3697_v5 = vmax.f32 %v3661_v56, 0.0  ;;  %p4352_p0 = pneg %p4351_p13 }
 0x29b   : > { %v3699_v61 = vmax.f32 %v3663_v41, 0.0  ;;  %v3695_v34 = vmax.f32 %v3659_v2, 0.0  ;;  %v5980_v2 = vld [vmem:[#allocation34_spill] sm:$0xff] }
 0x29c   : > { %v5676_v9 = vadd.f32 %v3454_v50, %v3185_v13  ;;  %4193 = vmatmul.msk.f32.gmra.mxu2 %vm317_vm0, %v2516_v11  ;;  %3747 = vmatpush.msrb.mxu1 %v3705_v38  ;;  %v3700_v47 = vmax.f32 %v3664_v30, 0.0  ;;  %v3696_v11 = vmax.f32 %v3660_v0, 0.0  ;;  %p4357_p5 = pnand %p4356_p3, %p4352_p0 }
 0x29d   : > { %4230 = vmatmul.msk.f32.gmra.mxu3 %vm317_vm0, %v2895_v23  ;;  %4266 = vmatmul.msk.f32.gmra.mxu0 %vm317_vm0, %v3273_v26 }
 0x29e   : > { %3748 = vmatpush.msrb.mxu1 %v3704_v52 }
 0x29f   : > { %v2699_v4 = vpop.f32.mrf.mxu2 }
 0x2a0   : > { %v2807_v25 = vadd.f32 %v2699_v4, %v5972_v24  ;;  %3749 = vmatpush.msrb.mxu1 %v3703_v57  ;;  %v3078_v62 = vpop.f32.mrf.mxu3 }
 0x2a1   : > { %v2338_v12 = vpop.f32.mrf.mxu1 }
 0x2a2   : > { %v5694_v59 = vadd.f32 %v2338_v12, %v2055_v10  ;;  %v3186_v63 = vadd.f32 %v3078_v62, %v2807_v25  ;;  %3750 = vmatpush.msrb.mxu1 %v3702_v37  ;;  %v3457_v54 = vpop.f32.mrf.mxu0 }
 0x2a4   : > { %v5701_v21 = vadd.f32 %v3457_v54, %v3186_v63  ;;  %4194 = vmatmul.msk.f32.gmra.mxu2 %vm317_vm0, %v2517_v45  ;;  %3751 = vmatpush.msrb.mxu1 %v3701_v51 }
 0x2a5   : > { %4231 = vmatmul.msk.f32.gmra.mxu3 %vm317_vm0, %v2896_v14  ;;  %4267 = vmatmul.msk.f32.gmra.mxu0 %vm317_vm0, %v3274_v19 }
 0x2a6   : > { %3752 = vmatpush.msrb.mxu1 %v3700_v47 }
 0x2a7   : > { %v2702_v35 = vpop.f32.mrf.mxu2 }
 0x2a8   : > { %v2808_v7 = vadd.f32 %v2702_v35, %v5979_v44  ;;  %3753 = vmatpush.msrb.mxu1 %v3699_v61  ;;  %v3081_v22 = vpop.f32.mrf.mxu3 }
 0x2a9   : > { %v5722_v10 = vpop.f32.mrf.mxu1 }
 0x2aa   : > { %v3187_v6 = vadd.f32 %v3081_v22, %v2808_v7  ;;  %3754 = vmatpush.msrb.mxu1 %v3698_v1  ;;  %v3460_v58 = vpop.f32.mrf.mxu0 }
 0x2ac   : > { %v5713_v48 = vadd.f32 %v3460_v58, %v3187_v6  ;;  %3755 = vmatpush.msrb.mxu1 %v3697_v5  ;;  %v5981_v6 = vld [vmem:[#allocation35_spill] sm:$0xff] }
 0x2ad   : > { %4268 = vmatmul.msk.f32.gmra.mxu0 %vm317_vm0, %v3275_v8  ;;  %v2061_v58 = vadd.f32 %v5981_v6, %v5980_v2  ;;  %v5982_v8 = vld [vmem:[#allocation32_spill] sm:$0xff] }
 0x2ae   : > { %3756 = vmatpush.msrb.mxu1 %v3696_v11  ;;  %v5983_v11 = vld [vmem:[#allocation33_spill] sm:$0xff] }
 0x2af   : > { %v2705_v13 = vpop.f32.mrf.mxu2 }
 0x2b0   : > { %v2809_v50 = vadd.f32 %v2705_v13, %v5594_v43  ;;  %3757 = vmatpush.msrb.mxu1 %v3695_v34  ;;  %v3084_v38 = vpop.f32.mrf.mxu3  ;;  %v2060_v34 = vadd.f32 %v5983_v11, %v5982_v8 }
 0x2b2   : > { %v3188_v23 = vadd.f32 %v3084_v38, %v2809_v50  ;;  %v3463_v26 = vpop.f32.mrf.mxu0  ;;  %v5984_v38 = vld [vmem:[#allocation30_spill] sm:$0xff] }
 0x2b4   : > { %v5717_v28 = vadd.f32 %v3463_v26, %v3188_v23  ;;  %v5985_v23 = vld [vmem:[#allocation31_spill] sm:$0xff] }
 0x2b5   : > { %v2059_v26 = vadd.f32 %v5985_v23, %v5984_v38 }
 0x2b7   : > { %v2708_v20 = vpop.f32.mrf.mxu2 }
 0x2b8   : > { %v2810_v52 = vadd.f32 %v2708_v20, %v5618_v16  ;;  %v3087_v33 = vpop.f32.mrf.mxu3  ;;  %v2344_v16 = vpop.f32.mrf.mxu1 }
 0x2ba   : > { %v3189_v53 = vadd.f32 %v3087_v33, %v2810_v52  ;;  %v3466_v57 = vpop.f32.mrf.mxu0 }
 0x2bc   : > { %v5720_v36 = vadd.f32 %v3466_v57, %v3189_v53  ;;  %v5986_v53 = vld [vmem:[#allocation28_spill] sm:$0xff]  ;;  %v5987_v57 = vld [vmem:[#allocation29_spill] sm:$0xff] }
 0x2bf   : > { %v2711_v4 = vpop.f32.mrf.mxu2 }
 0x2c0   : > { %v2811_v39 = vadd.f32 %v2711_v4, %v5645_v27  ;;  %v3090_v43 = vpop.f32.mrf.mxu3  ;;  %v2347_v51 = vpop.f32.mrf.mxu1  ;;  %v2058_v4 = vadd.f32 %v5987_v57, %v5986_v53 }
 0x2c2   : > { %v3190_v30 = vadd.f32 %v3090_v43, %v2811_v39  ;;  %v3469_v24 = vpop.f32.mrf.mxu0  ;;  %v5988_v39 = vld [vmem:[#allocation36_spill] sm:$0xff]  ;;  %v5989_v43 = vld [vmem:[#allocation37_spill] sm:$0xff] }
 0x2c4   : > { %v5725_v25 = vadd.f32 %v3469_v24, %v3190_v30  ;;  %v2062_v30 = vadd.f32 %v5989_v43, %v5988_v39 }
 0x2c7   : > { %v2714_v62 = vpop.f32.mrf.mxu2 }
 0x2c8   : > { %v2812_v37 = vadd.f32 %v2714_v62, %v5669_v49  ;;  %v3093_v18 = vpop.f32.mrf.mxu3  ;;  %v2350_v49 = vpop.f32.mrf.mxu1 }
 0x2c9   : > { %v2438_v24 = vadd.f32 %v2350_v49, %v2059_v26 }
 0x2ca   : > { %v3191_v3 = vadd.f32 %v3093_v18, %v2812_v37  ;;  %v3472_v55 = vpop.f32.mrf.mxu0  ;;  %v5990_v37 = vld [vmem:[#allocation26_spill] sm:$0xff]  ;;  %v5991_v18 = vld [vmem:[#allocation27_spill] sm:$0xff] }
 0x2cc   : > { %v5728_v12 = vadd.f32 %v3472_v55, %v3191_v3  ;;  %v2057_v3 = vadd.f32 %v5991_v18, %v5990_v37  ;;  %v3823_v37 = vld [vmem:[%s5903_s4 + $0x78] sm:$0xff]  ;;  %v3822_v18 = vld [vmem:[%s5903_s4 + $0x70] sm:$0xff] }
 0x2cd   : > { %3825 = vmatpush.msra.mxu1 %v3823_v37 }
 0x2ce   : > { %v2436_v6 = vadd.f32 %v2344_v16, %v2057_v3 }
 0x2cf   : > { %v2717_v45 = vpop.f32.mrf.mxu2  ;;  %3826 = vmatpush.msra.mxu1 %v3822_v18 }
 0x2d0   : > { %v2813_v41 = vadd.f32 %v2717_v45, %v5694_v59  ;;  %v3096_v63 = vpop.f32.mrf.mxu3  ;;  %v2353_v17 = vpop.f32.mrf.mxu1  ;;  %v2437_v45 = vadd.f32 %v2347_v51, %v2058_v4 }
 0x2d1   : > { %v2439_v20 = vadd.f32 %v2353_v17, %v2060_v34  ;;  %v5993_v17 = vld [vmem:[#allocation25_spill] sm:$0xff] }
 0x2d2   : > { %v3192_v54 = vadd.f32 %v3096_v63, %v2813_v41  ;;  %v3475_v27 = vpop.f32.mrf.mxu0 }
 0x2d4   : > { %v5731_v14 = vadd.f32 %v3475_v27, %v3192_v54  ;;  %v5992_v27 = vld [vmem:[#allocation24_spill] sm:$0xff] }
 0x2d6   : > { %v3683_v3 = vadd.f32 %v5626_v46, %v5731_v14  ;;  %v3820_v14 = vld [vmem:[%s5903_s4 + $0x60] sm:$0xff] }
 0x2d7   : > { %v2720_v19 = vpop.f32.mrf.mxu2 }
 0x2d8   : > { %v3099_v40 = vpop.f32.mrf.mxu3  ;;  %v2356_v35 = vpop.f32.mrf.mxu1 }
 0x2d9   : > { %v2440_v13 = vadd.f32 %v2356_v35, %v2061_v58  ;;  %v2056_v35 = vadd.f32 %v5993_v17, %v5992_v27  ;;  %v5994_v17 = vld [vmem:[#allocation42_spill] sm:$0xff] }
 0x2da   : > { %v5733_v32 = vpop.f32.mrf.mxu0 }
 0x2db   : > { %v2435_v49 = vadd.f32 %v5722_v10, %v2056_v35  ;;  %v5995_v35 = vld [vmem:[#allocation43_spill] sm:$0xff] }
 0x2dd   : > { %v2814_v51 = vadd.f32 %v2720_v19, %v2435_v49 }
 0x2df   : > { %v2723_v29 = vpop.f32.mrf.mxu2  ;;  %v3193_v53 = vadd.f32 %v3099_v40, %v2814_v51 }
 0x2e0   : > { %v3102_v31 = vpop.f32.mrf.mxu3  ;;  %v2359_v1 = vpop.f32.mrf.mxu1 }
 0x2e1   : > { %v2441_v41 = vadd.f32 %v2359_v1, %v2062_v30 }
 0x2e2   : > { %v3481_v47 = vpop.f32.mrf.mxu0 }
 0x2e7   : > { %v2726_v60 = vpop.f32.mrf.mxu2 }
 0x2e8   : > { %v3105_v42 = vpop.f32.mrf.mxu3  ;;  %v5747_v55 = vpop.f32.mrf.mxu1  ;;  %v2816_v58 = vadd.f32 %v2726_v60, %v2437_v45 }
 0x2ea   : > { %v3484_v56 = vpop.f32.mrf.mxu0  ;;  %v3195_v1 = vadd.f32 %v3105_v42, %v2816_v58  ;;  %v3719_v58 = vmax.f32 %v3683_v3, 0.0 }
 0x2ec   : > { %v3574_v10 = vadd.f32 %v3484_v56, %v3195_v1  ;;  %v3818_v1 = vld [vmem:[%s5903_s4 + $0x50] sm:$0xff] }
 0x2ee   : > { %v3686_v57 = vadd.f32 %v5626_v46, %v3574_v10 }
 0x2ef   : > { %v2729_v61 = vpop.f32.mrf.mxu2 }
 0x2f0   : > { %v3108_v59 = vpop.f32.mrf.mxu3  ;;  %v2817_v63 = vadd.f32 %v2729_v61, %v2438_v24  ;;  %v2365_v60 = vpop.f32.mrf.mxu1  ;;  %v5769_v24 = vld [vmem:[%s5900_s1] sm:$0x7] }
 0x2f2   : > { %v3487_v0 = vpop.f32.mrf.mxu0  ;;  %v3196_v34 = vadd.f32 %v3108_v59, %v2817_v63  ;;  %v3821_v63 = vld [vmem:[%s5903_s4 + $0x68] sm:$0xff] }
 0x2f3   : > { %3827 = vmatpush.msra.mxu1 %v3821_v63 }
 0x2f5   : > { %3828 = vmatpush.msra.mxu1 %v3820_v14 }
 0x2f7   : > { %v2732_v44 = vpop.f32.mrf.mxu2 }
 0x2f8   : > { %v3111_v7 = vpop.f32.mrf.mxu3  ;;  %v2818_v62 = vadd.f32 %v2732_v44, %v2439_v20  ;;  %v2815_v44 = vadd.f32 %v2723_v29, %v2436_v6  ;;  %v3575_v20 = vadd.f32 %v3487_v0, %v3196_v34  ;;  %v3572_v0 = vadd.f32 %v5733_v32, %v3193_v53  ;;  %v2368_v32 = vpop.f32.mrf.mxu1 }
 0x2f9   : > { %v3681_v6 = vadd.f32 %v5626_v46, %v5725_v25  ;;  %v5998_v25 = vld [vmem:[#allocation38_spill] sm:$0xff] }
 0x2fa   : > { %v3490_v22 = vpop.f32.mrf.mxu0  ;;  %v3194_v26 = vadd.f32 %v3102_v31, %v2815_v44  ;;  %v3687_v42 = vadd.f32 %v5626_v46, %v3575_v20  ;;  %v3684_v43 = vadd.f32 %v5626_v46, %v3572_v0  ;;  %v3680_v44 = vadd.f32 %v5626_v46, %v5720_v36 }
 0x2fc   : > { %v3573_v19 = vadd.f32 %v3481_v47, %v3194_v26  ;;  %v3723_v56 = vmax.f32 %v3687_v42, 0.0  ;;  %v3722_v47 = vmax.f32 %v3686_v57, 0.0  ;;  %v3720_v27 = vmax.f32 %v3684_v43, 0.0 }
 0x2fe   : > { %v3685_v40 = vadd.f32 %v5626_v46, %v3573_v19  ;;  %v3716_v19 = vmax.f32 %v3680_v44, 0.0 }
 0x2ff   : > { %v2735_v5 = vpop.f32.mrf.mxu2 }
 0x300   : > { %v3114_v50 = vpop.f32.mrf.mxu3  ;;  %v2819_v52 = vadd.f32 %v2735_v5, %v2440_v13  ;;  %v3197_v5 = vadd.f32 %v3111_v7, %v2818_v62  ;;  %v3734_v62 = vperm.slane %v5769_v24, 0  ;;  %v3721_v45 = vmax.f32 %v3685_v40, 0.0  ;;  %v2371_v10 = vpop.f32.mrf.mxu1 }
 0x302   : > { %v3493_v33 = vpop.f32.mrf.mxu0  ;;  %v3198_v54 = vadd.f32 %v3114_v50, %v2819_v52  ;;  %v3576_v61 = vadd.f32 %v3490_v22, %v3197_v5  ;;  %3758 = vmatmul.f32.vlgmr.msrb.gmra.mxu1 %v3734_v62 }
 0x304   : > { %v3577_v13 = vadd.f32 %v3493_v33, %v3198_v54  ;;  %v3688_v29 = vadd.f32 %v5626_v46, %v3576_v61  ;;  %v3682_v54 = vadd.f32 %v5626_v46, %v5728_v12  ;;  %v3819_v12 = vld [vmem:[%s5903_s4 + $0x58] sm:$0xff]  ;;  %v3679_v61 = vadd.f32 %v5626_v46, %v5717_v28 }
 0x305   : > { %3829 = vmatpush.msra.mxu1 %v3819_v12  ;;  %v3811_v12 = vld [vmem:[%s5903_s4 + $0x18] sm:$0xff] }
 0x306   : > { %v3689_v52 = vadd.f32 %v5626_v46, %v3577_v13  ;;  %v3724_v4 = vmax.f32 %v3688_v29, 0.0  ;;  %v3718_v34 = vmax.f32 %v3682_v54, 0.0  ;;  %v3817_v29 = vld [vmem:[%s5903_s4 + $0x48] sm:$0xff]  ;;  %v3715_v0 = vmax.f32 %v3679_v61, 0.0  ;;  %v3824_v61 = vld [vmem:[%s5904_s5] sm:$0x1] }
 0x307   : > { %v2738_v2 = vpop.f32.mrf.mxu2  ;;  %3830 = vmatpush.msra.mxu1 %v3818_v1 }
 0x308   : > { %v2820_v8 = vadd.f32 %v2738_v2, %v2441_v41  ;;  %v3117_v11 = vpop.f32.mrf.mxu3  ;;  %v3725_v22 = vmax.f32 %v3689_v52, 0.0  ;;  %v2065_v2 = vadd.f32 %v5995_v35, %v5994_v17  ;;  %v6000_v52 = vld [vmem:[#allocation44_spill] sm:$0xff] }
 0x309   : > { %3831 = vmatpush.msra.mxu1 %v3817_v29 }
 0x30a   : > { %v3199_v38 = vadd.f32 %v3117_v11, %v2820_v8  ;;  %v3496_v23 = vpop.f32.mrf.mxu0  ;;  %v5996_v8 = vld [vmem:[#allocation40_spill] sm:$0xff]  ;;  %v5997_v11 = vld [vmem:[#allocation41_spill] sm:$0xff]  ;;  %v2444_v13 = vadd.f32 %v2368_v32, %v2065_v2  ;;  %v3736_v2 = vperm.slane %v5769_v24, 2 }
 0x30b   : > { %v2064_v49 = vadd.f32 %v5997_v11, %v5996_v8  ;;  %v3810_v8 = vld [vmem:[%s5903_s4 + $0x10] sm:$0xff]  ;;  %v3809_v11 = vld [vmem:[%s5903_s4 + $0x8] sm:$0xff] }
 0x30c   : > { %v3578_v50 = vadd.f32 %v3496_v23, %v3199_v38  ;;  %v5999_v23 = vld [vmem:[#allocation39_spill] sm:$0xff] }
 0x30d   : > { %v2063_v51 = vadd.f32 %v5999_v23, %v5998_v25  ;;  %v2443_v26 = vadd.f32 %v2365_v60, %v2064_v49  ;;  %v3677_v60 = vadd.f32 %v5626_v46, %v5701_v21  ;;  %v3808_v49 = vld [vmem:[%s5903_s4] sm:$0xff] }
 0x30e   : > { %v3690_v16 = vadd.f32 %v5626_v46, %v3578_v50  ;;  %v3717_v50 = vmax.f32 %v3681_v6, 0.0 }
 0x30f   : > { %v5754_v7 = vpop.f32.mrf.mxu2  ;;  %v2442_v28 = vadd.f32 %v5747_v55, %v2063_v51  ;;  %v3676_v55 = vadd.f32 %v5626_v46, %v5676_v9  ;;  %v3713_v32 = vmax.f32 %v3677_v60, 0.0 }
 0x310   : > { %v3726_v59 = vmax.f32 %v3690_v16, 0.0  ;;  %v5757_v33 = vpop.f32.mrf.mxu3  ;;  %v6001_v16 = vld [vmem:[#allocation45_spill] sm:$0xff] }
 0x311   : > { %v2066_v53 = vadd.f32 %v6001_v16, %v6000_v52  ;;  %v3712_v3 = vmax.f32 %v3676_v55, 0.0 }
 0x312   : > { %3762 = vmatpush.msrb.mxu2 %v3726_v59  ;;  %v5760_v31 = vpop.f32.mrf.mxu0  ;;  %v3678_v59 = vadd.f32 %v5626_v46, %v5713_v48 }
 0x313   : > { %v2445_v57 = vadd.f32 %v2371_v10, %v2066_v53 }
 0x314   : > { %3763 = vmatpush.msrb.mxu2 %v3725_v22  ;;  %v3816_v22 = vld [vmem:[%s5903_s4 + $0x40] sm:$0xff] }
 0x315   : > { %3832 = vmatpush.msra.mxu1 %v3816_v22 }
 0x316   : > { %3764 = vmatpush.msrb.mxu2 %v3724_v4  ;;  %v2821_v4 = vadd.f32 %v5754_v7, %v2442_v28 }
 0x317   : > { %v2744_v39 = vpop.f32.mrf.mxu2 }
 0x318   : > { %3765 = vmatpush.msrb.mxu2 %v3723_v56  ;;  %v3123_v30 = vpop.f32.mrf.mxu3  ;;  %v2822_v42 = vadd.f32 %v2744_v39, %v2443_v26  ;;  %v3714_v56 = vmax.f32 %v3678_v59, 0.0  ;;  %v3200_v62 = vadd.f32 %v5757_v33, %v2821_v4 }
 0x31a   : > { %3766 = vmatpush.msrb.mxu2 %v3722_v47  ;;  %v5780_v41 = vpop.f32.mrf.mxu0  ;;  %v3201_v39 = vadd.f32 %v3123_v30, %v2822_v42  ;;  %v3675_v47 = vadd.f32 %v5626_v46, %v5651_v15  ;;  %v3735_v30 = vperm.slane %v5769_v24, 1  ;;  %v3579_v54 = vadd.f32 %v5760_v31, %v3200_v62  ;;  %v3815_v31 = vld [vmem:[%s5903_s4 + $0x38] sm:$0xff]  ;;  %v3813_v24 = vld [vmem:[%s5903_s4 + $0x28] sm:$0xff] }
 0x31b   : > { %3833 = vmatpush.msra.mxu1 %v3815_v31 }
 0x31c   : > { %3767 = vmatpush.msrb.mxu2 %v3721_v45  ;;  %v3580_v45 = vadd.f32 %v5780_v41, %v3201_v39  ;;  %v3711_v63 = vmax.f32 %v3675_v47, 0.0  ;;  %v3691_v17 = vadd.f32 %v5626_v46, %v3579_v54 }
 0x31e   : > { %3768 = vmatpush.msrb.mxu2 %v3720_v27  ;;  %v3692_v33 = vadd.f32 %v5626_v46, %v3580_v45  ;;  %v3727_v6 = vmax.f32 %v3691_v17, 0.0 }
 0x31f   : > { %v2747_v5 = vpop.f32.mrf.mxu2 }
 0x320   : > { %3769 = vmatpush.msrb.mxu2 %v3719_v58  ;;  %v3126_v38 = vpop.f32.mrf.mxu3  ;;  %v2823_v20 = vadd.f32 %v2747_v5, %v2444_v13  ;;  %v3728_v35 = vmax.f32 %v3692_v33, 0.0  ;;  %v4413_v58 = vmov 0.0   ;;  %v3812_v5 = vld [vmem:[%s5903_s4 + $0x20] sm:$0xff] }
 0x321   : > { %279 = vst [vmem:[#allocation3] sm:$0x1] %v4413_v58 }
 0x322   : > { %3770 = vmatpush.msrb.mxu2 %v3718_v34  ;;  %v3505_v36 = vpop.f32.mrf.mxu0  ;;  %v3202_v40 = vadd.f32 %v3126_v38, %v2823_v20 }
 0x324   : > { %3771 = vmatpush.msrb.mxu2 %v3717_v50  ;;  %v3581_v7 = vadd.f32 %v3505_v36, %v3202_v40 }
 0x326   : > { %3772 = vmatpush.msrb.mxu2 %v3716_v19  ;;  %v3693_v27 = vadd.f32 %v5626_v46, %v3581_v7 }
 0x327   : > { %v2750_v48 = vpop.f32.mrf.mxu2 }
 0x328   : > { %v2824_v43 = vadd.f32 %v2750_v48, %v2445_v57  ;;  %3773 = vmatpush.msrb.mxu2 %v3715_v0  ;;  %v3129_v21 = vpop.f32.mrf.mxu3  ;;  %v3729_v41 = vmax.f32 %v3693_v27, 0.0  ;;  %v3731_v38 = vld [vmem:[#allocation3] sm:$0x1] }
 0x32a   : > { %v3203_v37 = vadd.f32 %v3129_v21, %v2824_v43  ;;  %3774 = vmatpush.msrb.mxu2 %v3714_v56  ;;  %v3508_v18 = vpop.f32.mrf.mxu0 }
 0x32c   : > { %v3582_v9 = vadd.f32 %v3508_v18, %v3203_v37  ;;  %3775 = vmatpush.msrb.mxu2 %v3713_v32 }
 0x32e   : > { %v3694_v15 = vadd.f32 %v5626_v46, %v3582_v9  ;;  %3776 = vmatpush.msrb.mxu2 %v3712_v3  ;;  %v3814_v46 = vld [vmem:[%s5903_s4 + $0x30] sm:$0xff] }
 0x32f   : > { %3834 = vmatpush.msra.mxu1 %v3814_v46 }
 0x330   : > { %v3730_v14 = vmax.f32 %v3694_v15, 0.0  ;;  %3777 = vmatpush.msrb.mxu2 %v3711_v63 }
 0x331   : > { %3778 = vmatmul.f32.vlgmr.msrb.gmra.mxu2 %v3735_v30  ;;  %3835 = vmatpush.msra.mxu1 %v3813_v24 }
 0x332   : > { %3794 = vmatpush.msrb.mxu3 %v3730_v14 }
 0x333   : > { %3836 = vmatpush.msra.mxu1 %v3812_v5 }
 0x334   : > { %3795 = vmatpush.msrb.mxu3 %v3729_v41 }
 0x335   : > { %3837 = vmatpush.msra.mxu1 %v3811_v12 }
 0x336   : > { %3796 = vmatpush.msrb.mxu3 %v3728_v35 }
 0x337   : > { %3838 = vmatpush.msra.mxu1 %v3810_v8 }
 0x338   : > { %3797 = vmatpush.msrb.mxu3 %v3727_v6 }
 0x339   : > { %4269 = vmatmul.msk.f32.vlgmr.msrb.gmra.mxu3 %vm3739_vm1, %v3736_v2  ;;  %3839 = vmatpush.msra.mxu1 %v3809_v11 }
 0x33b   : > { %3840 = vmatpush.msra.mxu1 %v3808_v49 }
 0x37f   : > { %v3759_v44 = vpop.f32.mrf.mxu1 }
 0x3b4   : > { %v3779_v34 = vpop.f32.mrf.mxu2 }
 0x3b5   : > { %v3780_v13 = vadd.f32 %v3779_v34, %v3759_v44 }
 0x3bc   : > { %v3799_v25 = vpop.f32.mrf.mxu3 }
 0x3bd   : > { %v3800_v23 = vadd.f32 %v3799_v25, %v3780_v13 }
 0x3bf   : > { %v3802_v51 = vadd.f32 %v3800_v23, %v3731_v38 }
 0x3c1   : > { %3803 = vst [vmem:[#allocation3] sm:$0x1] %v3802_v51 }
 0x3c8   : > { %v3807_v1 = vld [vmem:[#allocation3] sm:$0x1] }
 0x3c9   : > { %3841 = vmatmul.f32.vlgmr.msra.gmra.mxu1 %v3807_v1 }
 0x446   : > { %v3842_v50 = vpop.f32.mrf.mxu1 }
 0x447   : > { %v3843_v26 = vadd.f32 %v3842_v50, %v3824_v61 }
 0x449   : > { %3845 = vst [vmem:[%s265_s27] sm:$0x1] %v3843_v26 }
 0x44a   : > { %4360 = shalt.err (!%p4357_p5)
}
 0x44b   : > { %4276 = dma.vmem_to_hbm [thread:$0]  (%p4489_p4), %s3858_s28, 16, %s3860_s17, %s3847_s30  }
 0x44c PF: > { %p4282_p6 = scmp.ge.s32.totalorder %s4411_s26, 2  ;;  %s3871_s14 = sand.u32 1, %s4391_s21  }
 0x44d   : > { %s3872_s18 = scalar_lea.sflag [#allocation5], %s3871_s14 }
 0x44e   : > { %p4279_p7 = pnand %p4282_p6, %p4496_p8 }
 0x450   : > { %p4280_p9 = pneg %p4279_p7 }
 0x452   : > { %4386 = dma.done.wait (%p4280_p9), %s3872_s18, 16  }
 0x453   : > { %4388 = vsyncadd (%p4280_p9), %s3872_s18, 4294967280  ;;  %s19_s26 = sadd.s32 1, %s4411_s26   ;;  %s6002_s21 = smov %s4395_s22 }
 0x454   : > { %p16_p10 = scmp.ge.s32.totalorder %s19_s26, 4   ;;  %s6003_s22 = smov %s4399_s23 }
 0x455   : > { %s6004_s23 = smov %s4502_s10  ;;  %s6005_s24 = smov %s4407_s25 }
 0x456   : > { %s6006_s25 = smov %s6008_s29  ;;  %18 = sbr.rel (!%p16_p10) target bundleno = 4 (0x4), region = 95 }
 0x45b   :  { %3877 = vsyncpa [#allocation5], 1 }
 0x45c   :  { %3879 = vsyncpa [#allocation5 + $0x1], 1 }

</bundles_post_ra>
